<compile_context>
chip_gen: v7x
topology: tpu7x:2x2x1
jax: 0.10.0
libtpu: 0.0.40
codegen_flags: <defaults>
</compile_context>

<pallas_src>
from functools import partial
from math import sqrt

import jax
import jax.numpy as jnp
from jax.experimental import pallas as pl
from jax.experimental.pallas import tpu as pltpu


def _noise_kernel(kr_ref, ki_ref, krt_ref, kit_ref, rr_ref, ri_ref, or_ref, oi_ref):
    """Grid = (batch, row_tiles).

    kr_ref / ki_ref   : (K, TM, D)  row-tile of real/imag Kraus operators
    krt_ref / kit_ref : (K, D, D)   precomputed real/imag transposes (for K^dagger)
    rr_ref / ri_ref   : (1, D, D)   real/imag of rho for this batch element
    or_ref / oi_ref   : (1, TM, D)  output row-tile (written once per step)
    """
    n_kraus = kr_ref.shape[0]

    R = rr_ref[0]                       # (D, D) real(rho_b)
    S = ri_ref[0]                       # (D, D) imag(rho_b)
    RS = R + S                          # shared by every Kraus term

    dot = partial(jnp.dot, preferred_element_type=jnp.float32)

    acc_r = jnp.zeros(or_ref.shape[1:], jnp.float32)
    acc_i = jnp.zeros(oi_ref.shape[1:], jnp.float32)

    for k in range(n_kraus):            # tiny static unroll (K = 2..4)
        A = kr_ref[k]                   # (TM, D) rows of real(K_k)
        B = ki_ref[k]                   # (TM, D) rows of imag(K_k)
        At = krt_ref[k]                 # (D, D)  real(K_k)^T  (precomputed, no XLU)
        Bt = kit_ref[k]                 # (D, D)  imag(K_k)^T

        # M = K_k[rows] @ rho  -- Karatsuba complex matmul (3 real matmuls).
        T1 = dot(A, R)
        T2 = dot(B, S)
        T3 = dot(A + B, RS)
        P = T1 - T2                     # real(M)
        Q = T3 - T1 - T2                # imag(M)

        # acc += M @ K_k^dagger, K^dagger = At - i*Bt  (3 more real matmuls).
        U1 = dot(P, At)
        U2 = dot(Q, Bt)
        U3 = dot(P + Q, At - Bt)
        acc_r = acc_r + (U1 + U2)       # = P@At + Q@Bt
        acc_i = acc_i + (U3 - U1 + U2)  # = Q@At - P@Bt

    or_ref[0] = acc_r
    oi_ref[0] = acc_i


def apply_noise_channel(rho: jnp.ndarray, kraus_full: jnp.ndarray,
                        row_tile: int | None = None) -> jnp.ndarray:
    """rho: (B, D, D) complex64, kraus_full: (K, D, D) complex64.
    Returns sum_k K_k rho K_k^dagger as (B, D, D) complex64."""
    Bsz, D, _ = rho.shape
    K = kraus_full.shape[0]

    # Small / non-lane-aligned D: masked narrow stores waste most of the vreg;
    # plain XLA is the better tool there.
    if D < 128 or D % 128 != 0:
        return jnp.einsum("kij,bjl,kml->bim", kraus_full, rho, jnp.conj(kraus_full))

    rr = jnp.real(rho).astype(jnp.float32)
    ri = jnp.imag(rho).astype(jnp.float32)
    kr = jnp.real(kraus_full).astype(jnp.float32)
    ki = jnp.imag(kraus_full).astype(jnp.float32)
    # K^dagger = conj(K)^T = kr^T - i*ki^T: transpose once here (tiny, static)
    # so the kernel never materializes an in-kernel transpose.
    krt = jnp.swapaxes(kr, -1, -2)
    kit = jnp.swapaxes(ki, -1, -2)

    if row_tile is None:
        row_tile = D if D <= 256 else 256
    row_tile = min(row_tile, D)
    assert D % row_tile == 0
    n_row = D // row_tile

    kraus_row_spec = pl.BlockSpec((K, row_tile, D), lambda b, i: (0, i, 0))
    kraus_full_spec = pl.BlockSpec((K, D, D), lambda b, i: (0, 0, 0))
    rho_spec = pl.BlockSpec((1, D, D), lambda b, i: (b, 0, 0))
    out_spec = pl.BlockSpec((1, row_tile, D), lambda b, i: (b, i, 0))

    # Rough VMEM budget (double-buffered blocks + in-kernel temporaries), with
    # headroom; keeps the compiler from silently shrinking the pipeline once D
    # grows past the default scoped limits (16/32 MiB on v5e/v6e).
    est = 4 * (
        2 * 2 * K * row_tile * D        # kr/ki row tiles (double-buffered)
        + 2 * 2 * K * D * D             # krt/kit full planes
        + 2 * 2 * D * D                 # rho planes
        + 2 * 2 * row_tile * D          # output planes
        + 10 * row_tile * D             # T1/T2/T3/P/Q/U* temporaries
    )
    vmem_limit = int(min(max(32 * 1024 * 1024, 2 * est), 100 * 1024 * 1024))

    out_r, out_i = pl.pallas_call(
        _noise_kernel,
        grid=(Bsz, n_row),
        in_specs=[kraus_row_spec, kraus_row_spec,
                  kraus_full_spec, kraus_full_spec,
                  rho_spec, rho_spec],
        out_specs=(out_spec, out_spec),
        out_shape=(
            jax.ShapeDtypeStruct((Bsz, D, D), jnp.float32),
            jax.ShapeDtypeStruct((Bsz, D, D), jnp.float32),
        ),
        compiler_params=pltpu.CompilerParams(
            dimension_semantics=("parallel", "parallel"),
            vmem_limit_bytes=vmem_limit,
        ),
    )(kr, ki, krt, kit, rr, ri)
    return (out_r + 1j * out_i).astype(jnp.complex64)


# ------------------------- glue (plain JAX) -------------------------

def density_mat(state: jnp.ndarray) -> jnp.ndarray:
    """state: (B, D) complex -> (B, D, D) density matrix |psi><psi|."""
    return jnp.einsum("bi,bj->bij", state, jnp.conj(state))


def promote_kraus(kraus_2x2: list[jnp.ndarray], target: int, n_qubits: int) -> jnp.ndarray:
    """Promote single-qubit (2,2) Kraus operators to the full 2^n Hilbert space."""
    ops = []
    for Kop in kraus_2x2:
        full = jnp.eye(2 ** target, dtype=Kop.dtype)
        full = jnp.kron(full, Kop)
        full = jnp.kron(full, jnp.eye(2 ** (n_qubits - target - 1), dtype=Kop.dtype))
        ops.append(full)
    return jnp.stack(ops, axis=0)


class NoisePallas:
    """JAX/Pallas equivalent of pyqtorch Noise (single-qubit channel)."""

    def __init__(self, kraus: list[jnp.ndarray], target: int, error_probability, n_qubits: int):
        self.target = target
        self.error_probability = error_probability
        self.n_qubits = n_qubits
        self.kraus_full = promote_kraus(kraus, target, n_qubits)

    def __call__(self, state: jnp.ndarray) -> jnp.ndarray:
        rho = state if state.ndim == 3 else density_mat(state)
        return apply_noise_channel(rho, self.kraus_full)


if __name__ == "__main__":
    n_qubits = 7            # D = 128, lane-aligned
    D = 2 ** n_qubits
    batch = 2
    target = 3
    p = 0.1

    # Bit-flip channel Kraus operators
    K0 = sqrt(1.0 - p) * jnp.eye(2, dtype=jnp.complex64)
    K1 = sqrt(p) * jnp.array([[0.0, 1.0], [1.0, 0.0]], dtype=jnp.complex64)

    # Deterministic random input state vectors, normalized
    key = jax.random.PRNGKey(0)
    kr_, ki_ = jax.random.split(key)
    psi = (jax.random.normal(kr_, (batch, D), dtype=jnp.float32)
           + 1j * jax.random.normal(ki_, (batch, D), dtype=jnp.float32)).astype(jnp.complex64)
    psi = psi / jnp.linalg.norm(psi, axis=-1, keepdims=True)

    noise = NoisePallas([K0, K1], target=target, error_probability=p, n_qubits=n_qubits)
    rho_out = noise(psi)
    rho_out = jax.block_until_ready(rho_out)

    # Reference check in plain JAX
    rho_in = density_mat(psi)
    Kf = noise.kraus_full
    rho_ref = jnp.einsum("kij,bjl,kml->bim", Kf, rho_in, jnp.conj(Kf))
    assert rho_out.shape == (batch, D, D)
    assert jnp.allclose(rho_out, rho_ref, atol=2e-5, rtol=2e-5)

    print("KERNEL_OK")
</pallas_src>

<mosaic_0001>
module attributes {stable_mosaic.version = 11 : i64} {
  func.func @_noise_kernel(%arg0: i32, %arg1: i32, %arg2: memref<2x128x128xf32, #tpu.memory_space<vmem>>, %arg3: memref<2x128x128xf32, #tpu.memory_space<vmem>>, %arg4: memref<2x128x128xf32, #tpu.memory_space<vmem>>, %arg5: memref<2x128x128xf32, #tpu.memory_space<vmem>>, %arg6: memref<1x128x128xf32, #tpu.memory_space<vmem>>, %arg7: memref<1x128x128xf32, #tpu.memory_space<vmem>>, %arg8: memref<1x128x128xf32, #tpu.memory_space<vmem>>, %arg9: memref<1x128x128xf32, #tpu.memory_space<vmem>>) attributes {dimension_semantics = [#tpu.dimension_semantics<parallel>, #tpu.dimension_semantics<parallel>], iteration_bounds = array<i64: 2, 1>, scalar_prefetch = 0 : i64, scratch_operands = 0 : i64, tpu.core_type = #tpu.core_type<tc>, window_params = [{transform_indices = @transform_0, window_bounds = array<i64: 2, 128, 128>}, {transform_indices = @transform_1, window_bounds = array<i64: 2, 128, 128>}, {pipeline_mode = #tpu.pipeline_mode<synchronous>, transform_indices = @transform_2, window_bounds = array<i64: 2, 128, 128>}, {pipeline_mode = #tpu.pipeline_mode<synchronous>, transform_indices = @transform_3, window_bounds = array<i64: 2, 128, 128>}, {transform_indices = @transform_4, window_bounds = array<i64: 1, 128, 128>}, {transform_indices = @transform_5, window_bounds = array<i64: 1, 128, 128>}, {transform_indices = @transform_6, window_bounds = array<i64: 1, 128, 128>}, {transform_indices = @transform_7, window_bounds = array<i64: 1, 128, 128>}]} {
    %c0 = arith.constant 0 : index
    %c0_0 = arith.constant 0 : index
    %c0_1 = arith.constant 0 : index
    %0 = vector.load %arg6[%c0, %c0_0, %c0_1] : memref<1x128x128xf32, #tpu.memory_space<vmem>>, vector<1x128x128xf32>
    %1 = vector.shape_cast %0 : vector<1x128x128xf32> to vector<128x128xf32>
    %c0_2 = arith.constant 0 : index
    %c0_3 = arith.constant 0 : index
    %c0_4 = arith.constant 0 : index
    %2 = vector.load %arg7[%c0_2, %c0_3, %c0_4] : memref<1x128x128xf32, #tpu.memory_space<vmem>>, vector<1x128x128xf32>
    %3 = vector.shape_cast %2 : vector<1x128x128xf32> to vector<128x128xf32>
    %4 = arith.addf %1, %3 : vector<128x128xf32>
    %cst = arith.constant 0.000000e+00 : f32
    %5 = vector.broadcast %cst : f32 to vector<128x128xf32>
    %cst_5 = arith.constant 0.000000e+00 : f32
    %6 = vector.broadcast %cst_5 : f32 to vector<128x128xf32>
    %c0_6 = arith.constant 0 : index
    %c0_7 = arith.constant 0 : index
    %c0_8 = arith.constant 0 : index
    %7 = vector.load %arg2[%c0_6, %c0_7, %c0_8] : memref<2x128x128xf32, #tpu.memory_space<vmem>>, vector<1x128x128xf32>
    %8 = vector.shape_cast %7 : vector<1x128x128xf32> to vector<128x128xf32>
    %c0_9 = arith.constant 0 : index
    %c0_10 = arith.constant 0 : index
    %c0_11 = arith.constant 0 : index
    %9 = vector.load %arg3[%c0_9, %c0_10, %c0_11] : memref<2x128x128xf32, #tpu.memory_space<vmem>>, vector<1x128x128xf32>
    %10 = vector.shape_cast %9 : vector<1x128x128xf32> to vector<128x128xf32>
    %c0_12 = arith.constant 0 : index
    %c0_13 = arith.constant 0 : index
    %c0_14 = arith.constant 0 : index
    %11 = vector.load %arg4[%c0_12, %c0_13, %c0_14] : memref<2x128x128xf32, #tpu.memory_space<vmem>>, vector<1x128x128xf32>
    %12 = vector.shape_cast %11 : vector<1x128x128xf32> to vector<128x128xf32>
    %c0_15 = arith.constant 0 : index
    %c0_16 = arith.constant 0 : index
    %c0_17 = arith.constant 0 : index
    %13 = vector.load %arg5[%c0_15, %c0_16, %c0_17] : memref<2x128x128xf32, #tpu.memory_space<vmem>>, vector<1x128x128xf32>
    %14 = vector.shape_cast %13 : vector<1x128x128xf32> to vector<128x128xf32>
    %cst_18 = arith.constant dense<0.000000e+00> : vector<128x128xf32>
    %15 = tpu.matmul %8, %1, %cst_18 {dimension_numbers = #tpu.dot_dimension_numbers<[1], [0], [0], [1], [0, 0, 1, 1], [], []>} : vector<128x128xf32>, vector<128x128xf32>, vector<128x128xf32> -> vector<128x128xf32>
    %cst_19 = arith.constant dense<0.000000e+00> : vector<128x128xf32>
    %16 = tpu.matmul %10, %3, %cst_19 {dimension_numbers = #tpu.dot_dimension_numbers<[1], [0], [0], [1], [0, 0, 1, 1], [], []>} : vector<128x128xf32>, vector<128x128xf32>, vector<128x128xf32> -> vector<128x128xf32>
    %17 = arith.addf %8, %10 : vector<128x128xf32>
    %cst_20 = arith.constant dense<0.000000e+00> : vector<128x128xf32>
    %18 = tpu.matmul %17, %4, %cst_20 {dimension_numbers = #tpu.dot_dimension_numbers<[1], [0], [0], [1], [0, 0, 1, 1], [], []>} : vector<128x128xf32>, vector<128x128xf32>, vector<128x128xf32> -> vector<128x128xf32>
    %19 = arith.subf %15, %16 : vector<128x128xf32>
    %20 = arith.subf %18, %15 : vector<128x128xf32>
    %21 = arith.subf %20, %16 : vector<128x128xf32>
    %cst_21 = arith.constant dense<0.000000e+00> : vector<128x128xf32>
    %22 = tpu.matmul %19, %12, %cst_21 {dimension_numbers = #tpu.dot_dimension_numbers<[1], [0], [0], [1], [0, 0, 1, 1], [], []>} : vector<128x128xf32>, vector<128x128xf32>, vector<128x128xf32> -> vector<128x128xf32>
    %cst_22 = arith.constant dense<0.000000e+00> : vector<128x128xf32>
    %23 = tpu.matmul %21, %14, %cst_22 {dimension_numbers = #tpu.dot_dimension_numbers<[1], [0], [0], [1], [0, 0, 1, 1], [], []>} : vector<128x128xf32>, vector<128x128xf32>, vector<128x128xf32> -> vector<128x128xf32>
    %24 = arith.addf %19, %21 : vector<128x128xf32>
    %25 = arith.subf %12, %14 : vector<128x128xf32>
    %cst_23 = arith.constant dense<0.000000e+00> : vector<128x128xf32>
    %26 = tpu.matmul %24, %25, %cst_23 {dimension_numbers = #tpu.dot_dimension_numbers<[1], [0], [0], [1], [0, 0, 1, 1], [], []>} : vector<128x128xf32>, vector<128x128xf32>, vector<128x128xf32> -> vector<128x128xf32>
    %27 = arith.addf %22, %23 : vector<128x128xf32>
    %28 = arith.addf %5, %27 : vector<128x128xf32>
    %29 = arith.subf %26, %22 : vector<128x128xf32>
    %30 = arith.addf %29, %23 : vector<128x128xf32>
    %31 = arith.addf %6, %30 : vector<128x128xf32>
    %c1 = arith.constant 1 : index
    %c0_24 = arith.constant 0 : index
    %c0_25 = arith.constant 0 : index
    %32 = vector.load %arg2[%c1, %c0_24, %c0_25] : memref<2x128x128xf32, #tpu.memory_space<vmem>>, vector<1x128x128xf32>
    %33 = vector.shape_cast %32 : vector<1x128x128xf32> to vector<128x128xf32>
    %c1_26 = arith.constant 1 : index
    %c0_27 = arith.constant 0 : index
    %c0_28 = arith.constant 0 : index
    %34 = vector.load %arg3[%c1_26, %c0_27, %c0_28] : memref<2x128x128xf32, #tpu.memory_space<vmem>>, vector<1x128x128xf32>
    %35 = vector.shape_cast %34 : vector<1x128x128xf32> to vector<128x128xf32>
    %c1_29 = arith.constant 1 : index
    %c0_30 = arith.constant 0 : index
    %c0_31 = arith.constant 0 : index
    %36 = vector.load %arg4[%c1_29, %c0_30, %c0_31] : memref<2x128x128xf32, #tpu.memory_space<vmem>>, vector<1x128x128xf32>
    %37 = vector.shape_cast %36 : vector<1x128x128xf32> to vector<128x128xf32>
    %c1_32 = arith.constant 1 : index
    %c0_33 = arith.constant 0 : index
    %c0_34 = arith.constant 0 : index
    %38 = vector.load %arg5[%c1_32, %c0_33, %c0_34] : memref<2x128x128xf32, #tpu.memory_space<vmem>>, vector<1x128x128xf32>
    %39 = vector.shape_cast %38 : vector<1x128x128xf32> to vector<128x128xf32>
    %cst_35 = arith.constant dense<0.000000e+00> : vector<128x128xf32>
    %40 = tpu.matmul %33, %1, %cst_35 {dimension_numbers = #tpu.dot_dimension_numbers<[1], [0], [0], [1], [0, 0, 1, 1], [], []>} : vector<128x128xf32>, vector<128x128xf32>, vector<128x128xf32> -> vector<128x128xf32>
    %cst_36 = arith.constant dense<0.000000e+00> : vector<128x128xf32>
    %41 = tpu.matmul %35, %3, %cst_36 {dimension_numbers = #tpu.dot_dimension_numbers<[1], [0], [0], [1], [0, 0, 1, 1], [], []>} : vector<128x128xf32>, vector<128x128xf32>, vector<128x128xf32> -> vector<128x128xf32>
    %42 = arith.addf %33, %35 : vector<128x128xf32>
    %cst_37 = arith.constant dense<0.000000e+00> : vector<128x128xf32>
    %43 = tpu.matmul %42, %4, %cst_37 {dimension_numbers = #tpu.dot_dimension_numbers<[1], [0], [0], [1], [0, 0, 1, 1], [], []>} : vector<128x128xf32>, vector<128x128xf32>, vector<128x128xf32> -> vector<128x128xf32>
    %44 = arith.subf %40, %41 : vector<128x128xf32>
    %45 = arith.subf %43, %40 : vector<128x128xf32>
    %46 = arith.subf %45, %41 : vector<128x128xf32>
    %cst_38 = arith.constant dense<0.000000e+00> : vector<128x128xf32>
    %47 = tpu.matmul %44, %37, %cst_38 {dimension_numbers = #tpu.dot_dimension_numbers<[1], [0], [0], [1], [0, 0, 1, 1], [], []>} : vector<128x128xf32>, vector<128x128xf32>, vector<128x128xf32> -> vector<128x128xf32>
    %cst_39 = arith.constant dense<0.000000e+00> : vector<128x128xf32>
    %48 = tpu.matmul %46, %39, %cst_39 {dimension_numbers = #tpu.dot_dimension_numbers<[1], [0], [0], [1], [0, 0, 1, 1], [], []>} : vector<128x128xf32>, vector<128x128xf32>, vector<128x128xf32> -> vector<128x128xf32>
    %49 = arith.addf %44, %46 : vector<128x128xf32>
    %50 = arith.subf %37, %39 : vector<128x128xf32>
    %cst_40 = arith.constant dense<0.000000e+00> : vector<128x128xf32>
    %51 = tpu.matmul %49, %50, %cst_40 {dimension_numbers = #tpu.dot_dimension_numbers<[1], [0], [0], [1], [0, 0, 1, 1], [], []>} : vector<128x128xf32>, vector<128x128xf32>, vector<128x128xf32> -> vector<128x128xf32>
    %52 = arith.addf %47, %48 : vector<128x128xf32>
    %53 = arith.addf %28, %52 : vector<128x128xf32>
    %54 = arith.subf %51, %47 : vector<128x128xf32>
    %55 = arith.addf %54, %48 : vector<128x128xf32>
    %56 = arith.addf %31, %55 : vector<128x128xf32>
    %c0_41 = arith.constant 0 : index
    %c0_42 = arith.constant 0 : index
    %c0_43 = arith.constant 0 : index
    %57 = vector.load %arg8[%c0_41, %c0_42, %c0_43] : memref<1x128x128xf32, #tpu.memory_space<vmem>>, vector<1x128x128xf32>
    %58 = vector.shape_cast %57 : vector<1x128x128xf32> to vector<128x128xf32>
    %59 = vector.shape_cast %53 : vector<128x128xf32> to vector<1x128x128xf32>
    tpu.vector_store %arg8[%c0_41, %c0_42, %c0_43], %59 {strides = array<i32>} : memref<1x128x128xf32, #tpu.memory_space<vmem>>, vector<1x128x128xf32>,
    %c0_44 = arith.constant 0 : index
    %c0_45 = arith.constant 0 : index
    %c0_46 = arith.constant 0 : index
    %60 = vector.load %arg9[%c0_44, %c0_45, %c0_46] : memref<1x128x128xf32, #tpu.memory_space<vmem>>, vector<1x128x128xf32>
    %61 = vector.shape_cast %60 : vector<1x128x128xf32> to vector<128x128xf32>
    %62 = vector.shape_cast %56 : vector<128x128xf32> to vector<1x128x128xf32>
    tpu.vector_store %arg9[%c0_44, %c0_45, %c0_46], %62 {strides = array<i32>} : memref<1x128x128xf32, #tpu.memory_space<vmem>>, vector<1x128x128xf32>,
    return
  }
  func.func @transform_0(%arg0: i32, %arg1: i32) -> (i32, i32, i32) {
    %c0_i32 = arith.constant 0 : i32
    %c0_i32_0 = arith.constant 0 : i32
    %c0_i32_1 = arith.constant 0 : i32
    return %c0_i32, %arg1, %c0_i32_0 : i32, i32, i32
  }
  func.func @transform_1(%arg0: i32, %arg1: i32) -> (i32, i32, i32) {
    %c0_i32 = arith.constant 0 : i32
    %c0_i32_0 = arith.constant 0 : i32
    %c0_i32_1 = arith.constant 0 : i32
    return %c0_i32, %arg1, %c0_i32_0 : i32, i32, i32
  }
  func.func @transform_2(%arg0: i32, %arg1: i32) -> (i32, i32, i32) {
    %c0_i32 = arith.constant 0 : i32
    %c0_i32_0 = arith.constant 0 : i32
    %c0_i32_1 = arith.constant 0 : i32
    %c0_i32_2 = arith.constant 0 : i32
    return %c0_i32, %c0_i32_0, %c0_i32_1 : i32, i32, i32
  }
  func.func @transform_3(%arg0: i32, %arg1: i32) -> (i32, i32, i32) {
    %c0_i32 = arith.constant 0 : i32
    %c0_i32_0 = arith.constant 0 : i32
    %c0_i32_1 = arith.constant 0 : i32
    %c0_i32_2 = arith.constant 0 : i32
    return %c0_i32, %c0_i32_0, %c0_i32_1 : i32, i32, i32
  }
  func.func @transform_4(%arg0: i32, %arg1: i32) -> (i32, i32, i32) {
    %c0_i32 = arith.constant 0 : i32
    %c0_i32_0 = arith.constant 0 : i32
    %c0_i32_1 = arith.constant 0 : i32
    return %arg0, %c0_i32, %c0_i32_0 : i32, i32, i32
  }
  func.func @transform_5(%arg0: i32, %arg1: i32) -> (i32, i32, i32) {
    %c0_i32 = arith.constant 0 : i32
    %c0_i32_0 = arith.constant 0 : i32
    %c0_i32_1 = arith.constant 0 : i32
    return %arg0, %c0_i32, %c0_i32_0 : i32, i32, i32
  }
  func.func @transform_6(%arg0: i32, %arg1: i32) -> (i32, i32, i32) {
    %c0_i32 = arith.constant 0 : i32
    %c0_i32_0 = arith.constant 0 : i32
    return %arg0, %arg1, %c0_i32 : i32, i32, i32
  }
  func.func @transform_7(%arg0: i32, %arg1: i32) -> (i32, i32, i32) {
    %c0_i32 = arith.constant 0 : i32
    %c0_i32_0 = arith.constant 0 : i32
    return %arg0, %arg1, %c0_i32 : i32, i32, i32
  }
}

</mosaic_0001>

<bundles_post_ra>
// kernel: tpu_custom_call.1
= control target key start
LH: loop header
LB: loop body
LE: loop exit
PB: predicated region body
PF: predicated region fallthrough
CT: control target
= control target key end

     0   :  { %s6483_s0 = inlined_call_operand.hbm [shape: f32[2,128,128], index: 0, kind: input, shape index: {}]   ;;  %s6484_s1 = inlined_call_operand.hbm [shape: f32[2,128,128], index: 1, kind: input, shape index: {}]   ;;  %s6485_s2 = inlined_call_operand.hbm [shape: f32[2,128,128], index: 2, kind: input, shape index: {}]   ;;  %s6486_s3 = inlined_call_operand.hbm [shape: f32[2,128,128], index: 3, kind: input, shape index: {}]   ;;  %s6487_s4 = inlined_call_operand.hbm [shape: f32[2,128,128], index: 4, kind: input, shape index: {}]   ;;  %s6488_s5 = inlined_call_operand.hbm [shape: f32[2,128,128], index: 5, kind: input, shape index: {}]   ;;  %s6489_s6 = inlined_call_operand.hbm [shape: f32[2,128,128], index: 6, kind: output, shape index: {0}]   ;;  %s6490_s7 = inlined_call_operand.hbm [shape: f32[2,128,128], index: 7, kind: output, shape index: {1}]  }
   0x1   :  { %6544 = sst [smem:[#allocation53_spill]] %s6483_s0 }
   0x2   :  { %6545 = sst [smem:[#allocation54_spill]] %s6484_s1 }
   0x3   :  { %6546 = sst [smem:[#allocation55_spill]] %s6487_s4 }
   0x4   :  { %6547 = sst [smem:[#allocation56_spill]] %s6490_s7 }
   0x5   :  { %13 = vsyncpa [#allocation3], 0 }
   0x6   :  { %14 = vsyncpa [#allocation6], 0 }
   0x7   :  { %15 = vsyncpa [#allocation9], 0 }
   0x8   :  { %16 = vsyncpa [#allocation4], 0 }
   0x9   :  { %18 = vsyncpa [#allocation4 + $0x1], 0 }
   0xa   :  { %19 = vsyncpa [#allocation14], 0 }
   0xb   :  { %21 = vsyncpa [#allocation14 + $0x1], 0  ;;  %s4905_s24 = smov 0   ;;  %s4907_s25 = smov 0  }
   0xc   :  { %s4909_s26 = smov 0   ;;  %s4911_s27 = smov 0  }
   0xd   :  { %s4913_s28 = smov 0   ;;  %s4915_s29 = smov 0  }
   0xe LB: > { %6548 = sst [smem:[#allocation21_spill]] %s4831_s24  ;;  %s4936_s30 = sadd.s32 4294967295, %s4851_s29   ;;  %s4851_s29 = sphi %s4915_s29, %s27_s29   ;;  %s4847_s28 = sphi %s4913_s28, %s6682_s28   ;;  %s4843_s27 = sphi %s4911_s27, %s6681_s27   ;;  %s4839_s26 = sphi %s4909_s26, %s6677_s26   ;;  %s4835_s25 = sphi %s4907_s25, %s6680_s25   ;;  %s4831_s24 = sphi %s4905_s24, %s6679_s24  }
   0xf   : > { %6549 = sst [smem:[#allocation22_spill]] %s4839_s26  ;;  %s2962_s8 = sadd.s32 4294967294, %s4851_s29  }
  0x10   : > { %6550 = sst [smem:[#allocation23_spill]] %s4851_s29  ;;  %p153_p0 = scmp.ne.s32.totalorder %s4835_s25, %s4831_s24 }
  0x11   : > { %p6491_p1 = scmp.eq.s32.totalorder %s4936_s30, 0  ;;  %p211_p3 = scmp.eq.s32.totalorder %s2962_s8, 1 }
  0x12   : > { %p2963_p5 = scmp.ge.s32.totalorder %s4851_s29, 1  ;;  %p246_p7 = scmp.lt.s32.totalorder %s4851_s29, 3 }
  0x13   : > { %p4945_p4 = por %p6491_p1, %p153_p0  ;;  %p4950_p6 = por %p211_p3, %p153_p0 }
  0x14   : > { %p4955_p8 = pnand %p2963_p5, %p246_p7  ;;  %s4853_s12 = smov [#allocation2]  }
  0x15   : > { %s6551_s9 = scalar_select %p4945_p4, 1, 0 }
  0x16   : > { %s6552_s10 = scalar_select %p4950_p6, 1, 0 }
  0x17   : > { %s6554_s11 = scalar_select %p4955_p8, 1, 0 }
  0x18   : > { %6553 = sst [smem:[#allocation24_spill]] %s6552_s10  ;;  %s261_s13 = sshll.u32 %s4853_s12, 4  ;;  %s4959_s13 = int_to_ptr.vmem [resolvable:$true] %s261_s13 }
  0x19   : > { %p4460_p9 = pneg %p4955_p8  ;;  %s4854_s15 = smov [#allocation5]  }
  0x1a   : > { %s277_s16 = sshll.u32 %s4854_s15, 4  ;;  %s6556_s0 = sld [smem:[#allocation53_spill]]  ;;  %s4970_s16 = int_to_ptr.vmem [resolvable:$true] %s277_s16 }
  0x1b   : > { %p4966_p11 = pnand %p4460_p9, %p6491_p1 }
  0x1d   : > { %s6555_s14 = scalar_select %p4966_p11, 1, 0 }
  0x1e   : > { %p4980_p13 = pneg %p4966_p11 }
  0x20   : > { %s4553_s19 = scalar_lea.hbm %s6556_s0, 4096 }
  0x21   : > { %p4554_p12 = scmp.ne.s32.totalorder %s6556_s0, %s4553_s19  ;;  %p4560_p5 = scmp.lt.u32.totalorder %s4553_s19, %s6556_s0 }
  0x23   : > { %p4556_p0 = pnand %p4980_p13, %p4554_p12 }
  0x25   : > { %p4557_p3 = pneg %p4556_p0 }
  0x27   : > { %p4562_p7 = pnand %p4560_p5, %p4557_p3 }
  0x29   : > { %4565 = shalt.err (!%p4562_p7)
}
  0x2a   : > { %s4566_s12 = scalar_lea.vmem %s4959_s13, 4096  ;;  %p4574_p2 = scmp.lt.s32.totalorder %s4959_s13, %s4959_s13 }
  0x2b   : > { %p4567_p9 = scmp.ne.s32.totalorder %s4959_s13, %s4566_s12  ;;  %p4575_p6 = scmp.lt.s32.totalorder %s4566_s12, %s4566_s12 }
  0x2d   : > { %p4569_p10 = pnand %p4567_p9, %p4980_p13  ;;  %p4576_p12 = por %p4575_p6, %p4574_p2 }
  0x2f   : > { %p4570_p1 = pneg %p4569_p10 }
  0x31   : > { %p4577_p0 = pnand %p4576_p12, %p4570_p1 }
  0x33   : > { %4580 = shalt.err (!%p4577_p0)
}
  0x34   : > { %s6494_s15 = smov 128   ;;  %s6496_s17 = smov 8  }
  0x35   : > { %4463 = dma.hbm_to_vmem [thread:$0]  (!%p4966_p11), %s6556_s0, 4096, %s4959_s13, [#allocation3], %s6494_s15, %s6494_s15, %s6496_s17  }
  0x36   : > { %s6558_s1 = sld [smem:[#allocation54_spill]] }
  0x3c   : > { %s4581_s23 = scalar_lea.hbm %s6558_s1, 4096 }
  0x3d   : > { %p4582_p1 = scmp.ne.s32.totalorder %s6558_s1, %s4581_s23  ;;  %p4588_p10 = scmp.lt.u32.totalorder %s4581_s23, %s6558_s1 }
  0x3f   : > { %p4584_p2 = pnand %p4582_p1, %p4980_p13 }
  0x41   : > { %p4585_p6 = pneg %p4584_p2 }
  0x43   : > { %p4590_p3 = pnand %p4588_p10, %p4585_p6 }
  0x45   : > { %4593 = shalt.err (!%p4590_p3)
}
  0x46   : > { %s4594_s13 = scalar_lea.vmem %s4970_s16, 4096  ;;  %p4602_p12 = scmp.lt.s32.totalorder %s4970_s16, %s4970_s16 }
  0x47   : > { %p4595_p5 = scmp.ne.s32.totalorder %s4970_s16, %s4594_s13  ;;  %p4603_p0 = scmp.lt.s32.totalorder %s4594_s13, %s4594_s13 }
  0x49   : > { %p4597_p7 = pnand %p4595_p5, %p4980_p13  ;;  %p4604_p1 = por %p4603_p0, %p4602_p12 }
  0x4b   : > { %p4598_p9 = pneg %p4597_p7 }
  0x4d   : > { %p4605_p2 = pnand %p4604_p1, %p4598_p9 }
  0x4f   : > { %4608 = shalt.err (!%p4605_p2)
}
  0x50   : > { %4466 = dma.hbm_to_vmem [thread:$0]  (!%p4966_p11), %s6558_s1, 4096, %s4970_s16, [#allocation6], %s6494_s15, %s6494_s15, %s6496_s17  }
  0x51   : > { %s39_s18 = sadd.s32 1, %s4847_s28  ;;  %s140_s19 = sadd.s32 1, %s4839_s26 }
  0x52   : > { %p41_p6 = scmp.ge.s32.totalorder %s39_s18, 2  ;;  %p147_p10 = scmp.ne.s32.totalorder %s4839_s26, %s4835_s25 }
  0x53   : > { %p148_p3 = scmp.eq.s32.totalorder %s4851_s29, 0  ;;  %p4491_p5 = scmp.lt.s32.totalorder %s4851_s29, 2 }
  0x54   : > { %s6684_s18 = smov (%p41_p6, %s39_s18), 0  ;;  %p6560_p9 = scmp.eq.s32.totalorder %s4936_s30, 1 }
  0x55   : > { %6559 = sst [smem:[#allocation25_spill]] %s6684_s18  ;;  %p149_p7 = por %p148_p3, %p147_p10 }
  0x56   : > { %p5040_p12 = por %p6560_p9, %p147_p10  ;;  %s137_s21 = ssub.s32 %s4847_s28, %s6684_s18 }
  0x57   : > { %s317_s23 = sand.u32 1, %s4851_s29   ;;  %p138_p0 = scmp.eq.s32.totalorder %s137_s21, 0 }
  0x58   : > { %s6561_s20 = scalar_select %p5040_p12, 1, 0 }
  0x59   : > { %s319_s16 = sand.u32 1, %s4839_s26   ;;  %s6498_s8 = sshll.u32 %s4847_s28, 11 }
  0x5a   : > { %s5050_s12 = scalar_select %p138_p0, %s4839_s26, %s140_s19  }
  0x5b   : > { %s5052_s13 = sshll.u32 %s319_s16, 7  ;;  %s6563_s4 = sld [smem:[#allocation55_spill]] }
  0x5c   : > { %6562 = sst [smem:[#allocation26_spill]] %s5050_s12  ;;  %p5061_p1 = pnand %p4491_p5, %p149_p7 }
  0x5d   : > { %s321_s19 = scalar_lea.vmem [#allocation10], %s5052_s13  ;;  %s5068_s16 = scalar_lea.sflag [#allocation3], %s317_s23 }
  0x5e   : > { %s6564_s17 = scalar_select %p5061_p1, 1, 0 }
  0x5f   : > { %s328_s21 = sshll.u32 %s321_s19, 4  ;;  %p6509_p6 = pneg %p5061_p1  ;;  %s5066_s21 = int_to_ptr.vmem [resolvable:$true] %s328_s21 }
  0x61   : > { %s5059_s15 = scalar_lea.hbm %s6563_s4, %s6498_s8  ;;  %s4614_s0 = scalar_lea.hbm %s6563_s4, 4096 }
  0x62   : > { %s4609_s24 = scalar_lea.hbm %s5059_s15, 2048  ;;  %p4615_p5 = scmp.lt.u32.totalorder %s5059_s15, %s6563_s4 }
  0x63   : > { %p4610_p2 = scmp.ne.s32.totalorder %s5059_s15, %s4609_s24  ;;  %p4616_p7 = scmp.lt.u32.totalorder %s4614_s0, %s4609_s24 }
  0x64   : > { %p4618_p0 = scmp.lt.u32.totalorder %s4609_s24, %s5059_s15 }
  0x65   : > { %p4612_p10 = pnand %p6509_p6, %p4610_p2  ;;  %p4617_p9 = por %p4616_p7, %p4615_p5 }
  0x67   : > { %p4613_p3 = pneg %p4612_p10  ;;  %p4619_p12 = por %p4618_p0, %p4617_p9 }
  0x69   : > { %p4620_p4 = pnand %p4619_p12, %p4613_p3 }
  0x6b   : > { %4623 = shalt.err (!%p4620_p4)
}
  0x6c   : > { %s4624_s23 = scalar_lea.vmem %s5066_s21, 2048  ;;  %s4857_s8 = smov [#allocation10]  }
  0x6d   : > { %p4625_p2 = scmp.ne.s32.totalorder %s5066_s21, %s4624_s23  ;;  %s4629_s19 = sshll.u32 %s4857_s8, 4  ;;  %s4630_s19 = int_to_ptr.vmem [resolvable:$false] %s4629_s19 }
  0x6e   : > { %s4631_s1 = scalar_lea.vmem %s4630_s19, 4096  ;;  %p4632_p11 = scmp.lt.s32.totalorder %s5066_s21, %s4630_s19 }
  0x6f   : > { %p4627_p10 = pnand %p4625_p2, %p6509_p6  ;;  %p4633_p5 = scmp.lt.s32.totalorder %s4631_s1, %s4624_s23 }
  0x71   : > { %p4628_p8 = pneg %p4627_p10  ;;  %p4634_p7 = por %p4633_p5, %p4632_p11 }
  0x73   : > { %p4635_p9 = pnand %p4634_p7, %p4628_p8 }
  0x75   : > { %4638 = shalt.err (!%p4635_p9)
}
  0x76   : > { %s6565_s0 = smov 8   ;;  %s6566_s18 = smov 128  }
  0x77   : > { %4476 = dma.hbm_to_vmem [thread:$0]  (!%p5061_p1), %s5059_s15, 2048, %s5066_s21, %s5068_s16, %s6566_s18, %s6566_s18, %s6565_s0  }
  0x78   : > { %s4858_s24 = smov [#allocation7]   ;;  %s4859_s8 = smov [#allocation8]  }
  0x79   : > { %s290_s10 = sshll.u32 %s4858_s24, 4  ;;  %s303_s4 = sshll.u32 %s4859_s8, 4  ;;  %s291_s10 = int_to_ptr.vmem [resolvable:$true] %s290_s10  ;;  %s304_s4 = int_to_ptr.vmem [resolvable:$true] %s303_s4 }
  0x7a   : > { %s4639_s1 = scalar_lea.hbm %s6485_s2, 4096 }
  0x7b   : > { %p4640_p4 = scmp.ne.s32.totalorder %s6485_s2, %s4639_s1  ;;  %p4646_p12 = scmp.lt.u32.totalorder %s4639_s1, %s6485_s2 }
  0x7d   : > { %p4642_p8 = pnand %p4640_p4, %p4980_p13 }
  0x7f   : > { %p4643_p11 = pneg %p4642_p8 }
  0x81   : > { %p4648_p3 = pnand %p4646_p12, %p4643_p11 }
  0x83   : > { %4651 = shalt.err (!%p4648_p3)
}
  0x84   : > { %s4652_s15 = scalar_lea.vmem %s291_s10, 4096  ;;  %p4660_p5 = scmp.lt.s32.totalorder %s291_s10, %s291_s10 }
  0x85   : > { %p4653_p0 = scmp.ne.s32.totalorder %s291_s10, %s4652_s15  ;;  %p4661_p7 = scmp.lt.s32.totalorder %s4652_s15, %s4652_s15 }
  0x87   : > { %p4655_p2 = pnand %p4653_p0, %p4980_p13  ;;  %p4662_p9 = por %p4661_p7, %p4660_p5 }
  0x89   : > { %p4656_p10 = pneg %p4655_p2 }
  0x8b   : > { %p4663_p6 = pnand %p4662_p9, %p4656_p10 }
  0x8d   : > { %4666 = shalt.err (!%p4663_p6)
}
  0x8e   : > { %p6567_p4 = scmp.ne.s32.totalorder %s6555_s14, 0  ;;  %s4667_s21 = scalar_lea.hbm %s6486_s3, 4096 }
  0x8f   : > { %p4668_p8 = scmp.ne.s32.totalorder %s6486_s3, %s4667_s21  ;;  %p4674_p12 = scmp.lt.u32.totalorder %s4667_s21, %s6486_s3 }
  0x90   : > { %4469 = dma.hbm_to_vmem [thread:$0]  (!%p6567_p4), %s6485_s2, 4096, %s291_s10, [#allocation6], %s6566_s18, %s6566_s18, %s6565_s0  }
  0x91   : > { %p4670_p6 = pnand %p4668_p8, %p4980_p13 }
  0x93   : > { %p4671_p11 = pneg %p4670_p6 }
  0x95   : > { %p4676_p3 = pnand %p4674_p12, %p4671_p11 }
  0x97   : > { %4679 = shalt.err (!%p4676_p3)
}
  0x98   : > { %s4680_s1 = scalar_lea.vmem %s304_s4, 4096  ;;  %p4688_p5 = scmp.lt.s32.totalorder %s304_s4, %s304_s4 }
  0x99   : > { %p4681_p0 = scmp.ne.s32.totalorder %s304_s4, %s4680_s1  ;;  %p4689_p7 = scmp.lt.s32.totalorder %s4680_s1, %s4680_s1 }
  0x9b   : > { %p4683_p2 = pnand %p4681_p0, %p4980_p13  ;;  %p4690_p9 = por %p4689_p7, %p4688_p5 }
  0x9d   : > { %p4684_p10 = pneg %p4683_p2 }
  0x9f   : > { %p4691_p1 = pnand %p4690_p9, %p4684_p10 }
  0xa1   : > { %4694 = shalt.err (!%p4691_p1)
}
  0xa2   : > { %4472 = dma.hbm_to_vmem [thread:$0]  (!%p6567_p4), %s6486_s3, 4096, %s304_s4, [#allocation9], %s6566_s18, %s6566_s18, %s6565_s0  }
  0xa3   : > { %s6568_s22 = sshll.u32 %s4847_s28, 11  ;;  %s342_s14 = scalar_lea.vmem [#allocation11], %s5052_s13 }
  0xa4   : > { %s5146_s29 = scalar_lea.hbm %s6488_s5, %s6568_s22  ;;  %s349_s12 = sshll.u32 %s342_s14, 4  ;;  %s5149_s12 = int_to_ptr.vmem [resolvable:$true] %s349_s12 }
  0xa5   : > { %s4695_s21 = scalar_lea.hbm %s5146_s29, 2048  ;;  %p6569_p1 = scmp.ne.s32.totalorder %s6564_s17, 0 }
  0xa6   : > { %p4696_p13 = scmp.ne.s32.totalorder %s5146_s29, %s4695_s21  ;;  %s4700_s8 = scalar_lea.hbm %s6488_s5, 4096 }
  0xa7   : > { %p6570_p8 = pneg %p6569_p1  ;;  %p4701_p11 = scmp.lt.u32.totalorder %s5146_s29, %s6488_s5 }
  0xa8   : > { %p4702_p12 = scmp.lt.u32.totalorder %s4700_s8, %s4695_s21  ;;  %p4704_p0 = scmp.lt.u32.totalorder %s4695_s21, %s5146_s29 }
  0xa9   : > { %p4698_p6 = pnand %p4696_p13, %p6570_p8 }
  0xaa   : > { %p4703_p3 = por %p4702_p12, %p4701_p11 }
  0xab   : > { %p4699_p4 = pneg %p4698_p6 }
  0xac   : > { %p4705_p2 = por %p4704_p0, %p4703_p3 }
  0xae   : > { %p4706_p10 = pnand %p4705_p2, %p4699_p4 }
  0xb0   : > { %4709 = shalt.err (!%p4706_p10)
}
  0xb1   : > { %s4710_s13 = scalar_lea.vmem %s5149_s12, 2048  ;;  %p6571_p7 = pmov %p6570_p8 }
  0xb2   : > { %p4711_p5 = scmp.ne.s32.totalorder %s5149_s12, %s4710_s13  ;;  %s4860_s1 = smov [#allocation11]  }
  0xb3   : > { %s4715_s10 = sshll.u32 %s4860_s1, 4  ;;  %s4716_s10 = int_to_ptr.vmem [resolvable:$false] %s4715_s10 }
  0xb4   : > { %p4713_p9 = pnand %p4711_p5, %p6571_p7  ;;  %s4717_s15 = scalar_lea.vmem %s4716_s10, 4096 }
  0xb5   : > { %p4718_p8 = scmp.lt.s32.totalorder %s5149_s12, %s4716_s10  ;;  %p4719_p6 = scmp.lt.s32.totalorder %s4717_s15, %s4710_s13 }
  0xb6   : > { %p4714_p13 = pneg %p4713_p9 }
  0xb7   : > { %p4720_p11 = por %p4719_p6, %p4718_p8 }
  0xb9   : > { %p4721_p12 = pnand %p4720_p11, %p4714_p13 }
  0xbb   : > { %4724 = shalt.err (!%p4721_p12)
}
  0xbc   : > { %4479 = dma.hbm_to_vmem [thread:$0]  (!%p6569_p1), %s5146_s29, 2048, %s5149_s12, %s5068_s16, %s6566_s18, %s6566_s18, %s6565_s0  }
  0xbd   : > { %p6572_p4 = scmp.ne.s32.totalorder %s6554_s11, 0 }
  0xbf   : > { %361 = sbr.rel (%p6572_p4) target bundleno = 1065 (0x429), region = 44 }
  0xc6   : > { %p6573_p3 = scmp.eq.s32.totalorder %s4936_s30, 0 }
  0xc8   : > { %4806 = dma.done.wait (%p6573_p3), [#allocation3], 4096   ;;  %p6574_p0 = pmov %p6573_p3 }
  0xca   : > { %4808 = vsyncadd (%p6574_p0), [#allocation3], 4294963200  ;;  %p6575_p2 = pmov %p6574_p0 }
  0xcb   : > { %p6576_p10 = pmov %p6574_p0 }
  0xcc   : > { %4810 = dma.done.wait (%p6575_p2), [#allocation6], 8192  }
  0xcd   : > { %4812 = vsyncadd (%p6576_p10), [#allocation6], 4294959104  ;;  %p6577_p5 = pmov %p6574_p0 }
  0xce   : > { %p6578_p1 = pmov %p6574_p0 }
  0xcf   : > { %4814 = dma.done.wait (%p6577_p5), [#allocation9], 4096  }
  0xd0   : > { %4816 = vsyncadd (%p6578_p1), [#allocation9], 4294963200  ;;  %s379_s11 = sand.u32 1, %s4936_s30   ;;  %s5194_s17 = sand.u32 1, %s4835_s25  }
  0xd1   : > { %s5197_s16 = sshll.u32 %s5194_s17, 7  ;;  %s380_s0 = scalar_lea.sflag [#allocation3], %s379_s11 }
  0xd2   : > { %s5200_s18 = scalar_lea.vmem [#allocation10], %s5197_s16  ;;  %p6579_p7 = scmp.ne.s32.totalorder %s6551_s9, 0 }
  0xd4   : > { %4818 = dma.done.wait (%p6579_p7), %s380_s0, 4096  }
  0xd5   : > { %4820 = vsyncadd (%p6579_p7), %s380_s0, 4294963200  ;;  %v5207_v0 = vld [vmem:[%s5200_s18] sm:$0xff]  ;;  %v5210_v1 = vld [vmem:[%s5200_s18 + $0x8] sm:$0xff]  ;;  %s5213_s30 = scalar_lea.vmem [#allocation11], %s5197_s16  ;;  %s6294_s9 = scalar_lea.vmem [#allocation12], %s5197_s16 }
  0xd6   : > { %v5216_v2 = vld [vmem:[%s5213_s30] sm:$0xff]  ;;  %v5220_v3 = vpack.c.bf16 %v5210_v1, %v5207_v0  ;;  %v5223_v4 = vld [vmem:[%s5213_s30 + $0x8] sm:$0xff]  ;;  %v5226_v5 = vld [vmem:[%s5200_s18 + $0x10] sm:$0xff]  ;;  %s6303_s22 = scalar_lea.vmem [#allocation13], %s5197_s16  ;;  %s2994_s7 = sshll.u32 %s4843_s27, 11 }
  0xd7   : > { %v5229_v6 = vld [vmem:[%s5200_s18 + $0x18] sm:$0xff]  ;;  %v5233_v7 = vpack.c.bf16 %v5223_v4, %v5216_v2  ;;  %v5240_v9 = vld [vmem:[%s5213_s30 + $0x10] sm:$0xff]  ;;  %v5246_v11 = vld [vmem:[%s5200_s18 + $0x20] sm:$0xff]  ;;  %v469_v49 = vadd.f32 %v5216_v2, %v5207_v0  ;;  %v470_v50 = vadd.f32 %v5223_v4, %v5210_v1  ;;  %s2762_s26 = sshll.u32 %s6294_s9, 4  ;;  %s6379_s12 = scalar_lea.hbm %s6489_s6, %s2994_s7  ;;  %s6381_s26 = int_to_ptr.vmem [resolvable:$true] %s2762_s26 }
  0xd8   : > { %v5237_v8 = vpack.c.bf16 %v5229_v6, %v5226_v5  ;;  %v5243_v10 = vld [vmem:[%s5213_s30 + $0x18] sm:$0xff]  ;;  %4053 = vmatprep.subr.bf16.mxu0 %v5220_v3  ;;  %v5254_v13 = vld [vmem:[%s5200_s18 + $0x28] sm:$0xff]  ;;  %v5257_v14 = vld [vmem:[%s5213_s30 + $0x20] sm:$0xff]  ;;  %v471_v55 = vadd.f32 %v5240_v9, %v5226_v5  ;;  %s2780_s21 = sshll.u32 %s6303_s22, 4  ;;  %s2742_s4 = scalar_lea.sflag [#allocation4], %s5194_s17  ;;  %s6429_s21 = int_to_ptr.vmem [resolvable:$true] %s2780_s21 }
  0xd9   : > { %v5251_v12 = vpack.c.bf16 %v5243_v10, %v5240_v9  ;;  %v5260_v15 = vld [vmem:[%s5213_s30 + $0x28] sm:$0xff]  ;;  %4085 = vmatprep.subr.bf16.mxu1 %v5233_v7  ;;  %4055 = vmatpush3.bf16.msra.mxu0 %v5220_v3  ;;  %v5268_v16 = vpack.c.bf16 %v5254_v13, %v5246_v11  ;;  %v5276_v18 = vld [vmem:[%s5200_s18 + $0x30] sm:$0xff]  ;;  %v5279_v19 = vld [vmem:[%s5200_s18 + $0x38] sm:$0xff]  ;;  %v5412_v54 = vpack.c.bf16 %v470_v50, %v469_v49  ;;  %s4725_s24 = scalar_lea.vmem %s6381_s26, 2048  ;;  %p6667_p13 = scmp.ne.s32.totalorder %s6561_s20, 0 }
  0xda   : > { %4087 = vmatpush3.bf16.msra.mxu1 %v5233_v7  ;;  %4057 = vmatprep.subr.bf16.mxu0 %v5237_v8  ;;  %v5273_v17 = vpack.c.bf16 %v5260_v15, %v5257_v14  ;;  %v5282_v20 = vld [vmem:[%s5213_s30 + $0x30] sm:$0xff]  ;;  %v5285_v21 = vld [vmem:[%s5213_s30 + $0x38] sm:$0xff]  ;;  %v5292_v22 = vpack.c.bf16 %v5279_v19, %v5276_v18  ;;  %v5300_v24 = vld [vmem:[%s5200_s18 + $0x40] sm:$0xff]  ;;  %v472_v56 = vadd.f32 %v5243_v10, %v5229_v6  ;;  %p4726_p9 = scmp.ne.s32.totalorder %s6381_s26, %s4725_s24  ;;  %s4861_s8 = smov [#allocation12]  }
  0xdb   : > { %4089 = vmatprep.subr.bf16.mxu1 %v5251_v12  ;;  %v5297_v23 = vpack.c.bf16 %v5285_v21, %v5282_v20  ;;  %v5303_v25 = vld [vmem:[%s5200_s18 + $0x48] sm:$0xff]  ;;  %v5305_v26 = vld [vmem:[#allocation2] sm:$0xff]  ;;  %v5330_v32 = vld [vmem:[%s5200_s18 + $0x50] sm:$0xff]  ;;  %6586 = vst [vmem:[#allocation33_spill] sm:$0xff] %v5412_v54  ;;  %v473_v1 = vadd.f32 %v5257_v14, %v5246_v11  ;;  %v474_v2 = vadd.f32 %v5260_v15, %v5254_v13  ;;  %s4729_s19 = sshll.u32 %s4861_s8, 4  ;;  %s4730_s19 = int_to_ptr.vmem [resolvable:$false] %s4729_s19 }
  0xdc   : > { %v5308_v27 = vld [vmem:[%s5213_s30 + $0x40] sm:$0xff]  ;;  %v5311_v28 = vld [vmem:[%s5213_s30 + $0x48] sm:$0xff]  ;;  %3412 = vmatprep.mubr.f32.mxu0 %v5305_v26  ;;  %v5322_v30 = vpack.c.bf16 %v5303_v25, %v5300_v24  ;;  %v5333_v33 = vld [vmem:[%s5200_s18 + $0x58] sm:$0xff]  ;;  %v5436_v0 = vpack.c.bf16 %v472_v56, %v471_v55  ;;  %v475_v15 = vadd.f32 %v5282_v20, %v5276_v18  ;;  %v476_v49 = vadd.f32 %v5285_v21, %v5279_v19  ;;  %p4727_p8 = pnand %p4726_p9, %p6667_p13  ;;  %s4731_s23 = scalar_lea.vmem %s4730_s19, 4096 }
  0xdd   : > { %4059 = vmatpush3.bf16.msra.mxu0 %v5237_v8  ;;  %v5314_v29 = vld [vmem:[#allocation5] sm:$0xff]  ;;  %v5327_v31 = vpack.c.bf16 %v5311_v28, %v5308_v27  ;;  %v5336_v34 = vld [vmem:[%s5213_s30 + $0x50] sm:$0xff]  ;;  %v5339_v35 = vld [vmem:[%s5213_s30 + $0x58] sm:$0xff]  ;;  %v5346_v36 = vpack.c.bf16 %v5333_v33, %v5330_v32  ;;  %v5462_v14 = vpack.c.bf16 %v474_v2, %v473_v1  ;;  %v478_v2 = vadd.f32 %v5311_v28, %v5303_v25  ;;  %p4732_p11 = scmp.lt.s32.totalorder %s6381_s26, %s4730_s19  ;;  %p4733_p12 = scmp.lt.s32.totalorder %s4731_s23, %s4725_s24 }
  0xde   : > { %4091 = vmatpush3.bf16.msra.mxu1 %v5251_v12  ;;  %4061 = vmatprep.subr.bf16.mxu0 %v5268_v16  ;;  %v5351_v37 = vpack.c.bf16 %v5339_v35, %v5336_v34  ;;  %v5354_v38 = vld [vmem:[%s5200_s18 + $0x60] sm:$0xff]  ;;  %v5357_v39 = vld [vmem:[%s5200_s18 + $0x68] sm:$0xff]  ;;  %v5378_v44 = vld [vmem:[%s5200_s18 + $0x70] sm:$0xff]  ;;  %6587 = vst [vmem:[#allocation34_spill] sm:$0xff] %v5436_v0  ;;  %v5488_v21 = vpack.c.bf16 %v476_v49, %v475_v15  ;;  %p4728_p6 = pneg %p4727_p8 }
  0xdf   : > { %4093 = vmatprep.subr.bf16.mxu1 %v5273_v17  ;;  %3468 = vmatprep.mubr.f32.mxu1 %v5314_v29  ;;  %6580 = vst [vmem:[#allocation27_spill] sm:$0xff] %v5346_v36  ;;  %v5360_v40 = vld [vmem:[%s5213_s30 + $0x60] sm:$0xff]  ;;  %v5363_v41 = vld [vmem:[%s5213_s30 + $0x68] sm:$0xff]  ;;  %v5370_v42 = vpack.c.bf16 %v5357_v39, %v5354_v38  ;;  %v5381_v45 = vld [vmem:[%s5200_s18 + $0x78] sm:$0xff]  ;;  %p4734_p4 = por %p4733_p12, %p4732_p11 }
  0xe0   : > { %6581 = vst [vmem:[#allocation28_spill] sm:$0xff] %v5351_v37  ;;  %v5375_v43 = vpack.c.bf16 %v5363_v41, %v5360_v40  ;;  %v5384_v46 = vld [vmem:[%s5213_s30 + $0x70] sm:$0xff]  ;;  %v5387_v47 = vld [vmem:[%s5213_s30 + $0x78] sm:$0xff]  ;;  %v5394_v48 = vpack.c.bf16 %v5381_v45, %v5378_v44  ;;  %v5405_v52 = vld [vmem:[#allocation7] sm:$0xff] }
  0xe1   : > { %4063 = vmatpush3.bf16.msra.mxu0 %v5268_v16  ;;  %6582 = vst [vmem:[#allocation29_spill] sm:$0xff] %v5370_v42  ;;  %v5403_v51 = vpack.c.bf16 %v5387_v47, %v5384_v46  ;;  %v5407_v53 = vld [vmem:[#allocation7 + $0x8] sm:$0xff]  ;;  %v5424_v59 = vld [vmem:[#allocation7 + $0x10] sm:$0xff]  ;;  %v5426_v60 = vld [vmem:[#allocation7 + $0x18] sm:$0xff]  ;;  %p4735_p3 = pnand %p4734_p4, %p4728_p6 }
  0xe2   : > { %4095 = vmatpush3.bf16.msra.mxu1 %v5273_v17  ;;  %4065 = vmatprep.subr.bf16.mxu0 %v5292_v22  ;;  %6583 = vst [vmem:[#allocation30_spill] sm:$0xff] %v5375_v43  ;;  %6584 = vst [vmem:[#allocation31_spill] sm:$0xff] %v5394_v48  ;;  %v4148_v57 = vpack.c.bf16 %v5407_v53, %v5405_v52  ;;  %v5422_v58 = vld [vmem:[#allocation2 + $0x8] sm:$0xff]  ;;  %v5432_v62 = vld [vmem:[#allocation2 + $0x10] sm:$0xff]  ;;  %v4152_v4 = vpack.c.bf16 %v5426_v60, %v5424_v59 }
  0xe3   : > { %4097 = vmatprep.subr.bf16.mxu1 %v5297_v23  ;;  %6585 = vst [vmem:[#allocation32_spill] sm:$0xff] %v5403_v51  ;;  %v5429_v61 = vld [vmem:[#allocation5 + $0x8] sm:$0xff]  ;;  %v5434_v63 = vld [vmem:[#allocation5 + $0x10] sm:$0xff]  ;;  %v5447_v5 = vld [vmem:[#allocation2 + $0x18] sm:$0xff] }
  0xe4   : > { %v5449_v6 = vld [vmem:[#allocation7 + $0x20] sm:$0xff]  ;;  %v5451_v9 = vld [vmem:[#allocation7 + $0x28] sm:$0xff]  ;;  %v5455_v10 = vld [vmem:[#allocation5 + $0x18] sm:$0xff]  ;;  %6588 = vst [vmem:[#allocation35_spill] sm:$0xff] %v5462_v14 }
  0xe5   : > { %4067 = vmatpush3.bf16.msra.mxu0 %v5292_v22  ;;  %v5458_v11 = vld [vmem:[#allocation2 + $0x20] sm:$0xff]  ;;  %v4156_v50 = vpack.c.bf16 %v5451_v9, %v5449_v6  ;;  %v5473_v55 = vld [vmem:[#allocation2 + $0x28] sm:$0xff]  ;;  %v5475_v56 = vld [vmem:[#allocation7 + $0x30] sm:$0xff]  ;;  %6589 = vst [vmem:[#allocation36_spill] sm:$0xff] %v5488_v21 }
  0xe6   : > { %4099 = vmatpush3.bf16.msra.mxu1 %v5297_v23  ;;  %4069 = vmatprep.subr.bf16.mxu0 %v5322_v30  ;;  %v5460_v13 = vld [vmem:[#allocation5 + $0x20] sm:$0xff]  ;;  %v5477_v1 = vld [vmem:[#allocation7 + $0x38] sm:$0xff]  ;;  %v5481_v18 = vld [vmem:[#allocation5 + $0x28] sm:$0xff] }
  0xe7   : > { %4101 = vmatprep.subr.bf16.mxu1 %v5327_v31  ;;  %v5484_v19 = vld [vmem:[#allocation2 + $0x30] sm:$0xff]  ;;  %v5501_v15 = vld [vmem:[#allocation7 + $0x40] sm:$0xff]  ;;  %v5503_v49 = vld [vmem:[#allocation7 + $0x48] sm:$0xff] }
  0xe8   : > { %v5486_v20 = vld [vmem:[#allocation5 + $0x30] sm:$0xff]  ;;  %v5510_v25 = vld [vmem:[#allocation2 + $0x40] sm:$0xff] }
  0xe9   : > { %4071 = vmatpush3.bf16.msra.mxu0 %v5322_v30 }
  0xea   : > { %4103 = vmatpush3.bf16.msra.mxu1 %v5327_v31  ;;  %4073 = vmatprep.subr.bf16.mxu0 %v5346_v36 }
  0xeb   : > { %4105 = vmatprep.subr.bf16.mxu1 %v5351_v37 }
  0xed   : > { %4075 = vmatpush3.bf16.msra.mxu0 %v5346_v36  ;;  %v498_v36 = vld [vmem:[#allocation2 + $0x68] sm:$0xff] }
  0xee   : > { %4107 = vmatpush3.bf16.msra.mxu1 %v5351_v37  ;;  %4077 = vmatprep.subr.bf16.mxu0 %v5370_v42 }
  0xef   : > { %4109 = vmatprep.subr.bf16.mxu1 %v5375_v43 }
  0xf1   : > { %4079 = vmatpush3.bf16.msra.mxu0 %v5370_v42  ;;  %v496_v42 = vld [vmem:[#allocation2 + $0x58] sm:$0xff] }
  0xf2   : > { %4111 = vmatpush3.bf16.msra.mxu1 %v5375_v43  ;;  %4081 = vmatprep.subr.bf16.mxu0 %v5394_v48 }
  0xf3   : > { %4113 = vmatprep.subr.bf16.mxu1 %v5403_v51 }
  0xf5   : > { %4083 = vmatpush3.bf16.msra.mxu0 %v5394_v48  ;;  %v5525_v48 = vld [vmem:[#allocation2 + $0x48] sm:$0xff] }
  0xf6   : > { %4115 = vmatpush3.bf16.msra.mxu1 %v5403_v51  ;;  %4117 = vmatprep.subr.bf16.mxu0 %v5412_v54  ;;  %v4164_v51 = vpack.c.bf16 %v5503_v49, %v5501_v15 }
  0xf7   : > { %4149 = vmatprep.subr.bf16.mxu1 %v4148_v57 }
  0xf8   : > { %3413 = vmatmul.mubr.f32.vlgmr.msra.gmra.mrb[0].mxu0 %v5422_v58 }
  0xf9   : > { %3469 = vmatmul.mubr.f32.vlgmr.msra.gmra.mrb[0].mxu1 %v5429_v61  ;;  %4119 = vmatpush3.bf16.msra.mxu0 %v5412_v54  ;;  %v5499_v54 = vld [vmem:[#allocation2 + $0x38] sm:$0xff] }
  0xfa   : > { %3415 = vmatprep.mubr.f32.mxu0 %v5432_v62  ;;  %3471 = vmatprep.mubr.f32.mxu1 %v5434_v63 }
  0xfb   : > { %4121 = vmatprep.subr.bf16.mxu0 %v5436_v0  ;;  %4151 = vmatpush3.bf16.msra.mxu1 %v4148_v57  ;;  %v477_v57 = vadd.f32 %v5308_v27, %v5300_v24  ;;  %v5507_v24 = vld [vmem:[#allocation5 + $0x38] sm:$0xff]  ;;  %v5512_v27 = vld [vmem:[#allocation5 + $0x40] sm:$0xff] }
  0xfc   : > { %3416 = vmatmul.mubr.f32.gmra.mrb[2].mxu0 %v5447_v5  ;;  %4153 = vmatprep.subr.bf16.mxu1 %v4152_v4 }
  0xfd   : > { %3472 = vmatmul.mubr.f32.gmra.mrb[2].mxu1 %v5455_v10  ;;  %4123 = vmatpush3.bf16.msra.mxu0 %v5436_v0  ;;  %v4160_v0 = vpack.c.bf16 %v5477_v1, %v5475_v56  ;;  %v5514_v28 = vpack.c.bf16 %v478_v2, %v477_v57  ;;  %v5527_v57 = vld [vmem:[#allocation7 + $0x50] sm:$0xff]  ;;  %v5529_v2 = vld [vmem:[#allocation7 + $0x58] sm:$0xff] }
  0xfe   : > { %3418 = vmatprep.mubr.f32.mxu0 %v5458_v11  ;;  %3474 = vmatprep.mubr.f32.mxu1 %v5460_v13  ;;  %v4168_v43 = vpack.c.bf16 %v5529_v2, %v5527_v57 }
  0xff   : > { %4125 = vmatprep.subr.bf16.mxu0 %v5462_v14  ;;  %4155 = vmatpush3.bf16.msra.mxu1 %v4152_v4  ;;  %6590 = vst [vmem:[#allocation37_spill] sm:$0xff] %v5514_v28  ;;  %v479_v4 = vadd.f32 %v5336_v34, %v5330_v32  ;;  %v5533_v32 = vld [vmem:[#allocation5 + $0x48] sm:$0xff]  ;;  %v5538_v34 = vld [vmem:[#allocation5 + $0x50] sm:$0xff] }
 0x100   : > { %3419 = vmatmul.mubr.f32.gmra.mrb[4].mxu0 %v5473_v55  ;;  %4157 = vmatprep.subr.bf16.mxu1 %v4156_v50 }
 0x101   : > { %3475 = vmatmul.mubr.f32.gmra.mrb[4].mxu1 %v5481_v18  ;;  %4127 = vmatpush3.bf16.msra.mxu0 %v5462_v14  ;;  %v480_v14 = vadd.f32 %v5339_v35, %v5333_v33  ;;  %v5536_v33 = vld [vmem:[#allocation2 + $0x50] sm:$0xff] }
 0x102   : > { %3421 = vmatprep.mubr.f32.mxu0 %v5484_v19  ;;  %3477 = vmatprep.mubr.f32.mxu1 %v5486_v20 }
 0x103   : > { %4129 = vmatprep.subr.bf16.mxu0 %v5488_v21  ;;  %4159 = vmatpush3.bf16.msra.mxu1 %v4156_v50  ;;  %v5540_v35 = vpack.c.bf16 %v480_v14, %v479_v4  ;;  %v481_v50 = vadd.f32 %v5360_v40, %v5354_v38  ;;  %v5551_v14 = vld [vmem:[#allocation7 + $0x60] sm:$0xff]  ;;  %v5553_v4 = vld [vmem:[#allocation7 + $0x68] sm:$0xff]  ;;  %v512_v38 = vld [vmem:[#allocation5 + $0x58] sm:$0xff] }
 0x104   : > { %3422 = vmatmul.mubr.f32.gmra.mrb[6].mxu0 %v5499_v54  ;;  %4161 = vmatprep.subr.bf16.mxu1 %v4160_v0  ;;  %v513_v40 = vld [vmem:[#allocation5 + $0x60] sm:$0xff]  ;;  %v4172_v37 = vpack.c.bf16 %v5553_v4, %v5551_v14 }
 0x105   : > { %3478 = vmatmul.mubr.f32.gmra.mrb[6].mxu1 %v5507_v24  ;;  %4131 = vmatpush3.bf16.msra.mxu0 %v5488_v21  ;;  %6591 = vst [vmem:[#allocation38_spill] sm:$0xff] %v5540_v35  ;;  %v482_v21 = vadd.f32 %v5363_v41, %v5357_v39  ;;  %v497_v39 = vld [vmem:[#allocation2 + $0x60] sm:$0xff] }
 0x106   : > { %3424 = vmatprep.mubr.f32.mxu0 %v5510_v25  ;;  %3480 = vmatprep.mubr.f32.mxu1 %v5512_v27 }
 0x107   : > { %4133 = vmatprep.subr.bf16.mxu0 %v5514_v28  ;;  %4163 = vmatpush3.bf16.msra.mxu1 %v4160_v0  ;;  %v5558_v41 = vpack.c.bf16 %v482_v21, %v481_v50  ;;  %v483_v0 = vadd.f32 %v5384_v46, %v5378_v44  ;;  %v514_v21 = vld [vmem:[#allocation5 + $0x68] sm:$0xff]  ;;  %v499_v50 = vld [vmem:[#allocation2 + $0x70] sm:$0xff] }
 0x108   : > { %3425 = vmatmul.mubr.f32.gmra.mrb[8].mxu0 %v5525_v48  ;;  %4165 = vmatprep.subr.bf16.mxu1 %v4164_v51  ;;  %v515_v44 = vld [vmem:[#allocation5 + $0x70] sm:$0xff] }
 0x109   : > { %3481 = vmatmul.mubr.f32.gmra.mrb[8].mxu1 %v5533_v32  ;;  %4135 = vmatpush3.bf16.msra.mxu0 %v5514_v28  ;;  %6592 = vst [vmem:[#allocation39_spill] sm:$0xff] %v5558_v41  ;;  %v484_v28 = vadd.f32 %v5387_v47, %v5381_v45  ;;  %v500_v45 = vld [vmem:[#allocation2 + $0x78] sm:$0xff]  ;;  %v839_v47 = vadd.f32 %v5314_v29, %v5305_v26 }
 0x10a   : > { %3427 = vmatprep.mubr.f32.mxu0 %v5536_v33  ;;  %3483 = vmatprep.mubr.f32.mxu1 %v5538_v34  ;;  %v842_v26 = vadd.f32 %v5455_v10, %v5447_v5  ;;  %v843_v29 = vadd.f32 %v5460_v13, %v5458_v11  ;;  %v849_v5 = vadd.f32 %v5538_v34, %v5536_v33  ;;  %v536_v33 = vld [vmem:[#allocation8 + $0x18] sm:$0xff] }
 0x10b   : > { %4137 = vmatprep.subr.bf16.mxu0 %v5540_v35  ;;  %4167 = vmatpush3.bf16.msra.mxu1 %v4164_v51  ;;  %v5568_v46 = vpack.c.bf16 %v484_v28, %v483_v0  ;;  %v516_v51 = vld [vmem:[#allocation5 + $0x78] sm:$0xff]  ;;  %v840_v28 = vadd.f32 %v5429_v61, %v5422_v58  ;;  %v845_v58 = vadd.f32 %v5486_v20, %v5484_v19  ;;  %v534_v20 = vld [vmem:[#allocation8 + $0x8] sm:$0xff] }
 0x10c   : > { %3428 = vmatmul.mubr.f32.gmra.mrb[10].mxu0 %v496_v42  ;;  %4169 = vmatprep.subr.bf16.mxu1 %v4168_v43  ;;  %v846_v61 = vadd.f32 %v5507_v24, %v5499_v54  ;;  %v850_v10 = vadd.f32 %v512_v38, %v496_v42  ;;  %v851_v11 = vadd.f32 %v513_v40, %v497_v39  ;;  %v533_v42 = vld [vmem:[#allocation8] sm:$0xff]  ;;  %v538_v0 = vld [vmem:[#allocation8 + $0x28] sm:$0xff] }
 0x10d   : > { %3484 = vmatmul.mubr.f32.gmra.mrb[10].mxu1 %v512_v38  ;;  %4139 = vmatpush3.bf16.msra.mxu0 %v5540_v35  ;;  %6593 = vst [vmem:[#allocation40_spill] sm:$0xff] %v5568_v46  ;;  %v852_v13 = vadd.f32 %v514_v21, %v498_v36  ;;  %v853_v54 = vadd.f32 %v515_v44, %v499_v50 }
 0x10e   : > { %3430 = vmatprep.mubr.f32.mxu0 %v497_v39  ;;  %3486 = vmatprep.mubr.f32.mxu1 %v513_v40  ;;  %v4180_v24 = vpack.c.bf16 %v534_v20, %v533_v42  ;;  %v1357_v39 = vsub.f32 %v5426_v60, %v536_v33 }
 0x10f   : > { %4141 = vmatprep.subr.bf16.mxu0 %v5558_v41  ;;  %4171 = vmatpush3.bf16.msra.mxu1 %v4168_v43  ;;  %v841_v43 = vadd.f32 %v5434_v63, %v5432_v62  ;;  %v847_v62 = vadd.f32 %v5512_v27, %v5510_v25  ;;  %v848_v63 = vadd.f32 %v5533_v32, %v5525_v48  ;;  %v5597_v48 = vld [vmem:[#allocation7 + $0x78] sm:$0xff]  ;;  %v535_v32 = vld [vmem:[#allocation8 + $0x10] sm:$0xff] }
 0x110   : > { %3431 = vmatmul.mubr.f32.gmra.mrb[12].mxu0 %v498_v36  ;;  %4173 = vmatprep.subr.bf16.mxu1 %v4172_v37  ;;  %v1354_v36 = vsub.f32 %v5405_v52, %v533_v42  ;;  %v1355_v25 = vsub.f32 %v5407_v53, %v534_v20  ;;  %v4184_v34 = vpack.c.bf16 %v536_v33, %v535_v32  ;;  %v537_v52 = vld [vmem:[#allocation8 + $0x20] sm:$0xff] }
 0x111   : > { %3487 = vmatmul.mubr.f32.gmra.mrb[12].mxu1 %v514_v21  ;;  %4143 = vmatpush3.bf16.msra.mxu0 %v5558_v41  ;;  %v1356_v38 = vsub.f32 %v5424_v59, %v535_v32  ;;  %v4188_v53 = vpack.c.bf16 %v538_v0, %v537_v52  ;;  %v1358_v21 = vsub.f32 %v5449_v6, %v537_v52 }
 0x112   : > { %3433 = vmatprep.mubr.f32.mxu0 %v499_v50  ;;  %3489 = vmatprep.mubr.f32.mxu1 %v515_v44  ;;  %v5603_v27 = vpack.c.bf16 %v1355_v25, %v1354_v36  ;;  %v1359_v50 = vsub.f32 %v5451_v9, %v538_v0 }
 0x113   : > { %4145 = vmatprep.subr.bf16.mxu0 %v5568_v46  ;;  %4175 = vmatpush3.bf16.msra.mxu1 %v4172_v37  ;;  %v844_v37 = vadd.f32 %v5481_v18, %v5473_v55  ;;  %v854_v55 = vadd.f32 %v516_v51, %v500_v45  ;;  %v5595_v18 = vld [vmem:[#allocation7 + $0x70] sm:$0xff]  ;;  %v5608_v40 = vpack.c.bf16 %v1357_v39, %v1356_v38 }
 0x114   : > { %3434 = vmatmul.mubr.f32.gmra.mrb[14].mxu0 %v500_v45  ;;  %v4176_v19 = vpack.c.bf16 %v5597_v48, %v5595_v18  ;;  %v5612_v44 = vpack.c.bf16 %v1359_v50, %v1358_v21  ;;  %v539_v45 = vld [vmem:[#allocation8 + $0x30] sm:$0xff] }
 0x115   : > { %3490 = vmatmul.mubr.f32.gmra.mrb[14].mxu1 %v516_v51  ;;  %4147 = vmatpush3.bf16.msra.mxu0 %v5568_v46  ;;  %v1360_v60 = vsub.f32 %v5475_v56, %v539_v45 }
 0x116   : > { %3524 = vmatprep.mubr.f32.mxu0 %v839_v47  ;;  %4177 = vmatprep.subr.bf16.mxu1 %v4176_v19  ;;  %v540_v47 = vld [vmem:[#allocation8 + $0x38] sm:$0xff] }
 0x117   : > { %4179 = vmatpush3.bf16.msra.mxu1 %v4176_v19  ;;  %4181 = vmatprep.subr.bf16.mxu0 %v4180_v24  ;;  %v4192_v59 = vpack.c.bf16 %v540_v47, %v539_v45  ;;  %v1361_v51 = vsub.f32 %v5477_v1, %v540_v47 }
 0x118   : > { %3525 = vmatmul.mubr.f32.vlgmr.msra.gmra.mrb[16].mxu0 %v840_v28  ;;  %4213 = vmatprep.subr.bf16.mxu1 %v5603_v27 }
 0x119   : > { %3527 = vmatprep.mubr.f32.mxu0 %v841_v43  ;;  %4183 = vmatpush3.bf16.msra.mxu0 %v4180_v24  ;;  %v5616_v28 = vpack.c.bf16 %v1361_v51, %v1360_v60  ;;  %v541_v43 = vld [vmem:[#allocation8 + $0x40] sm:$0xff] }
 0x11a   : > { %4185 = vmatprep.subr.bf16.mxu0 %v4184_v34  ;;  %v1362_v9 = vsub.f32 %v5501_v15, %v541_v43 }
 0x11c   : > { %3528 = vmatmul.mubr.f32.gmra.mrb[18].mxu0 %v842_v26  ;;  %v542_v26 = vld [vmem:[#allocation8 + $0x48] sm:$0xff] }
 0x11d   : > { %3530 = vmatprep.mubr.f32.mxu0 %v843_v29  ;;  %4187 = vmatpush3.bf16.msra.mxu0 %v4184_v34  ;;  %v4196_v6 = vpack.c.bf16 %v542_v26, %v541_v43  ;;  %v1363_v29 = vsub.f32 %v5503_v49, %v542_v26 }
 0x11e   : > { %4189 = vmatprep.subr.bf16.mxu0 %v4188_v53 }
 0x120   : > { %3531 = vmatmul.mubr.f32.gmra.mrb[20].mxu0 %v844_v37  ;;  %v5620_v37 = vpack.c.bf16 %v1363_v29, %v1362_v9 }
 0x121   : > { %3533 = vmatprep.mubr.f32.mxu0 %v845_v58  ;;  %4191 = vmatpush3.bf16.msra.mxu0 %v4188_v53  ;;  %v543_v58 = vld [vmem:[#allocation8 + $0x50] sm:$0xff] }
 0x122   : > { %4193 = vmatprep.subr.bf16.mxu0 %v4192_v59  ;;  %v1364_v1 = vsub.f32 %v5527_v57, %v543_v58 }
 0x124   : > { %3534 = vmatmul.mubr.f32.gmra.mrb[22].mxu0 %v846_v61  ;;  %v544_v61 = vld [vmem:[#allocation8 + $0x58] sm:$0xff] }
 0x125   : > { %3536 = vmatprep.mubr.f32.mxu0 %v847_v62  ;;  %4195 = vmatpush3.bf16.msra.mxu0 %v4192_v59  ;;  %v4200_v56 = vpack.c.bf16 %v544_v61, %v543_v58  ;;  %v1365_v62 = vsub.f32 %v5529_v2, %v544_v61 }
 0x126   : > { %4197 = vmatprep.subr.bf16.mxu0 %v4196_v6 }
 0x128   : > { %3537 = vmatmul.mubr.f32.gmra.mrb[24].mxu0 %v848_v63  ;;  %v5624_v63 = vpack.c.bf16 %v1365_v62, %v1364_v1 }
 0x129   : > { %3539 = vmatprep.mubr.f32.mxu0 %v849_v5  ;;  %4199 = vmatpush3.bf16.msra.mxu0 %v4196_v6  ;;  %v545_v5 = vld [vmem:[#allocation8 + $0x60] sm:$0xff] }
 0x12a   : > { %4201 = vmatprep.subr.bf16.mxu0 %v4200_v56  ;;  %v1366_v49 = vsub.f32 %v5551_v14, %v545_v5 }
 0x12c   : > { %3540 = vmatmul.mubr.f32.gmra.mrb[26].mxu0 %v850_v10  ;;  %v546_v10 = vld [vmem:[#allocation8 + $0x68] sm:$0xff] }
 0x12d   : > { %3542 = vmatprep.mubr.f32.mxu0 %v851_v11  ;;  %4203 = vmatpush3.bf16.msra.mxu0 %v4200_v56  ;;  %v4204_v15 = vpack.c.bf16 %v546_v10, %v545_v5  ;;  %v1367_v11 = vsub.f32 %v5553_v4, %v546_v10 }
 0x12f   : > { %4205 = vmatprep.subr.bf16.mxu0 %v4204_v15 }
 0x130   : > { %3543 = vmatmul.mubr.f32.gmra.mrb[28].mxu0 %v852_v13  ;;  %v5628_v13 = vpack.c.bf16 %v1367_v11, %v1366_v49 }
 0x131   : > { %3545 = vmatprep.mubr.f32.mxu0 %v853_v54  ;;  %4207 = vmatpush3.bf16.msra.mxu0 %v4204_v15  ;;  %v547_v54 = vld [vmem:[#allocation8 + $0x70] sm:$0xff] }
 0x132   : > { %v1368_v2 = vsub.f32 %v5595_v18, %v547_v54 }
 0x134   : > { %3546 = vmatmul.mubr.f32.gmra.mrb[30].mxu0 %v854_v55  ;;  %v548_v55 = vld [vmem:[#allocation8 + $0x78] sm:$0xff] }
 0x135   : > { %v4208_v57 = vpack.c.bf16 %v548_v55, %v547_v54  ;;  %v1369_v19 = vsub.f32 %v5597_v48, %v548_v55 }
 0x137   : > { %4209 = vmatprep.subr.bf16.mxu0 %v4208_v57  ;;  %v5632_v42 = vpack.c.bf16 %v1369_v19, %v1368_v2 }
 0x138   : > { %4211 = vmatpush3.bf16.msra.mxu0 %v4208_v57 }
 0x139   : > { %4245 = vmatprep.subr.bf16.mxu0 %v5220_v3 }
 0x1cb   : > { %v5635_v14 = vpop.f32.mrb[0].mxu0 }
 0x1cc   : > { %v5637_v4 = vpop.f32.mrb[0].mxu1  ;;  %v5639_v20 = vpop.f32.mrb[1].mxu0 }
 0x1cd   : > { %v5643_v24 = vsub.f32 %v5635_v14, %v5637_v4  ;;  %v5645_v36 = vpop.f32.mrb[1].mxu1 }
 0x1ce   : > { %v5649_v18 = vsub.f32 %v5639_v20, %v5645_v36 }
 0x1cf   : > { %v5651_v48 = vpop.f32.mrb[2].mxu0 }
 0x1d0   : > { %v5653_v25 = vpop.f32.mrb[2].mxu1  ;;  %3580 = vmatprep.mubr.f32.mxu1 %v5649_v18  ;;  %v5656_v32 = vpop.f32.mrb[3].mxu0 }
 0x1d1   : > { %v5660_v33 = vsub.f32 %v5651_v48, %v5653_v25  ;;  %v5662_v34 = vpop.f32.mrb[3].mxu1  ;;  %3581 = vmatmul.mubr.f32.vlgmr.msra.gmra.mrb[16].mxu1 %v5643_v24 }
 0x1d2   : > { %v5667_v38 = vsub.f32 %v5656_v32, %v5662_v34  ;;  %4215 = vmatpush3.bf16.msra.mxu1 %v5603_v27 }
 0x1d3   : > { %v5670_v39 = vpop.f32.mrb[4].mxu0  ;;  %4217 = vmatprep.subr.bf16.mxu1 %v5608_v40 }
 0x1d4   : > { %v5673_v52 = vpop.f32.mrb[4].mxu1  ;;  %3583 = vmatprep.mubr.f32.mxu1 %v5667_v38  ;;  %v5676_v0 = vpop.f32.mrb[5].mxu0 }
 0x1d5   : > { %v5680_v53 = vsub.f32 %v5670_v39, %v5673_v52  ;;  %v5682_v21 = vpop.f32.mrb[5].mxu1  ;;  %3584 = vmatmul.mubr.f32.gmra.mrb[18].mxu1 %v5660_v33 }
 0x1d6   : > { %v5687_v27 = vsub.f32 %v5676_v0, %v5682_v21  ;;  %4219 = vmatpush3.bf16.msra.mxu1 %v5608_v40 }
 0x1d7   : > { %v5690_v50 = vpop.f32.mrb[6].mxu0  ;;  %4221 = vmatprep.subr.bf16.mxu1 %v5612_v44 }
 0x1d8   : > { %v5693_v45 = vpop.f32.mrb[6].mxu1  ;;  %3586 = vmatprep.mubr.f32.mxu1 %v5687_v27  ;;  %v5696_v47 = vpop.f32.mrb[7].mxu0 }
 0x1d9   : > { %v5700_v59 = vsub.f32 %v5690_v50, %v5693_v45  ;;  %v5702_v60 = vpop.f32.mrb[7].mxu1  ;;  %3587 = vmatmul.mubr.f32.gmra.mrb[20].mxu1 %v5680_v53 }
 0x1da   : > { %v5707_v40 = vsub.f32 %v5696_v47, %v5702_v60  ;;  %4223 = vmatpush3.bf16.msra.mxu1 %v5612_v44 }
 0x1db   : > { %v5710_v51 = vpop.f32.mrb[8].mxu0  ;;  %4225 = vmatprep.subr.bf16.mxu1 %v5616_v28 }
 0x1dc   : > { %v5713_v43 = vpop.f32.mrb[8].mxu1  ;;  %3589 = vmatprep.mubr.f32.mxu1 %v5707_v40  ;;  %v5716_v26 = vpop.f32.mrb[9].mxu0 }
 0x1dd   : > { %v5720_v6 = vsub.f32 %v5710_v51, %v5713_v43  ;;  %v5722_v9 = vpop.f32.mrb[9].mxu1  ;;  %3590 = vmatmul.mubr.f32.gmra.mrb[22].mxu1 %v5700_v59 }
 0x1de   : > { %v5727_v44 = vsub.f32 %v5716_v26, %v5722_v9  ;;  %4227 = vmatpush3.bf16.msra.mxu1 %v5616_v28 }
 0x1df   : > { %v5730_v29 = vpop.f32.mrb[10].mxu0  ;;  %4229 = vmatprep.subr.bf16.mxu1 %v5620_v37 }
 0x1e0   : > { %v5733_v58 = vpop.f32.mrb[10].mxu1  ;;  %3592 = vmatprep.mubr.f32.mxu1 %v5727_v44  ;;  %v5736_v61 = vpop.f32.mrb[11].mxu0 }
 0x1e1   : > { %v5740_v56 = vsub.f32 %v5730_v29, %v5733_v58  ;;  %v5742_v1 = vpop.f32.mrb[11].mxu1  ;;  %3593 = vmatmul.mubr.f32.gmra.mrb[24].mxu1 %v5720_v6 }
 0x1e2   : > { %v5747_v28 = vsub.f32 %v5736_v61, %v5742_v1  ;;  %4231 = vmatpush3.bf16.msra.mxu1 %v5620_v37 }
 0x1e3   : > { %v5750_v62 = vpop.f32.mrb[12].mxu0  ;;  %4233 = vmatprep.subr.bf16.mxu1 %v5624_v63 }
 0x1e4   : > { %v5753_v5 = vpop.f32.mrb[12].mxu1  ;;  %3595 = vmatprep.mubr.f32.mxu1 %v5747_v28  ;;  %v5756_v10 = vpop.f32.mrb[13].mxu0 }
 0x1e5   : > { %v5760_v15 = vsub.f32 %v5750_v62, %v5753_v5  ;;  %v5762_v49 = vpop.f32.mrb[13].mxu1  ;;  %3596 = vmatmul.mubr.f32.gmra.mrb[26].mxu1 %v5740_v56 }
 0x1e6   : > { %v5767_v37 = vsub.f32 %v5756_v10, %v5762_v49  ;;  %4235 = vmatpush3.bf16.msra.mxu1 %v5624_v63 }
 0x1e7   : > { %v5770_v11 = vpop.f32.mrb[14].mxu0  ;;  %4237 = vmatprep.subr.bf16.mxu1 %v5628_v13 }
 0x1e8   : > { %6594 = vst [vmem:[#allocation41_spill] sm:$0xff] %v5767_v37  ;;  %v5773_v54 = vpop.f32.mrb[14].mxu1  ;;  %3598 = vmatprep.mubr.f32.mxu1 %v5767_v37  ;;  %v5776_v55 = vpop.f32.mrb[15].mxu0 }
 0x1e9   : > { %6595 = vst [vmem:[#allocation42_spill] sm:$0xff] %v5773_v54  ;;  %v5780_v57 = vsub.f32 %v5770_v11, %v5773_v54  ;;  %v5782_v2 = vpop.f32.mrb[15].mxu1  ;;  %3599 = vmatmul.mubr.f32.gmra.mrb[28].mxu1 %v5760_v15 }
 0x1ea   : > { %6596 = vst [vmem:[#allocation43_spill] sm:$0xff] %v5782_v2  ;;  %v5787_v63 = vsub.f32 %v5776_v55, %v5782_v2  ;;  %4239 = vmatpush3.bf16.msra.mxu1 %v5628_v13 }
 0x1eb   : > { %v3526_v19 = vpop.f32.mrb[16].mxu0  ;;  %4241 = vmatprep.subr.bf16.mxu1 %v5632_v42 }
 0x1ec   : > { %6597 = vst [vmem:[#allocation44_spill] sm:$0xff] %v5787_v63  ;;  %v1017_v46 = vsub.f32 %v3526_v19, %v5635_v14  ;;  %3601 = vmatprep.mubr.f32.mxu1 %v5787_v63  ;;  %v921_v41 = vpop.f32.mrb[17].mxu0 }
 0x1ed   : > { %v1016_v35 = vsub.f32 %v921_v41, %v5639_v20  ;;  %3602 = vmatmul.mubr.f32.gmra.mrb[30].mxu1 %v5780_v57 }
 0x1ee   : > { %v1033_v54 = vsub.f32 %v1017_v46, %v5637_v4  ;;  %4243 = vmatpush3.bf16.msra.mxu1 %v5632_v42 }
 0x1ef   : > { %v1032_v2 = vsub.f32 %v1016_v35, %v5645_v36  ;;  %v3529_v37 = vpop.f32.mrb[18].mxu0  ;;  %4277 = vmatprep.subr.bf16.mxu1 %v5233_v7 }
 0x1f0   : > { %v1339_v13 = vadd.f32 %v1033_v54, %v5643_v24  ;;  %v1019_v14 = vsub.f32 %v3529_v37, %v5651_v48  ;;  %v931_v19 = vpop.f32.mrb[19].mxu0 }
 0x1f1   : > { %v1018_v63 = vsub.f32 %v931_v19, %v5656_v32  ;;  %3636 = vmatprep.mubr.f32.mxu0 %v1032_v2  ;;  %v1338_v41 = vadd.f32 %v1032_v2, %v5649_v18  ;;  %v6603_v2 = vld [vmem:[#allocation30_spill] sm:$0xff]  ;;  %v5870_v19 = vld [vmem:[#allocation2 + $0x80] sm:$0xff] }
 0x1f2   : > { %v1035_v20 = vsub.f32 %v1019_v14, %v5653_v25  ;;  %3637 = vmatmul.mubr.f32.vlgmr.msra.gmra.mrb[32].mxu0 %v1033_v54 }
 0x1f3   : > { %v1034_v46 = vsub.f32 %v1018_v63, %v5662_v34  ;;  %v3532_v42 = vpop.f32.mrb[20].mxu0  ;;  %3692 = vmatprep.mubr.f32.mxu1 %v1338_v41  ;;  %4247 = vmatpush3.bf16.msra.mxu0 %v5220_v3  ;;  %v6604_v63 = vld [vmem:[#allocation43_spill] sm:$0xff]  ;;  %v6607_v41 = vld [vmem:[#allocation32_spill] sm:$0xff] }
 0x1f4   : > { %v1021_v35 = vsub.f32 %v3532_v42, %v5670_v39  ;;  %v941_v4 = vpop.f32.mrb[21].mxu0  ;;  %3693 = vmatmul.mubr.f32.vlgmr.msra.gmra.mrb[32].mxu1 %v1339_v13  ;;  %4249 = vmatprep.subr.bf16.mxu0 %v5237_v8  ;;  %v1341_v24 = vadd.f32 %v1035_v20, %v5660_v33  ;;  %v6605_v13 = vld [vmem:[#allocation31_spill] sm:$0xff]  ;;  %v6608_v42 = vld [vmem:[#allocation33_spill] sm:$0xff] }
 0x1f5   : > { %v1020_v36 = vsub.f32 %v941_v4, %v5676_v0  ;;  %3639 = vmatprep.mubr.f32.mxu0 %v1034_v46  ;;  %4279 = vmatpush3.bf16.msra.mxu1 %v5233_v7  ;;  %v1340_v18 = vadd.f32 %v1034_v46, %v5667_v38  ;;  %v5876_v46 = vld [vmem:[#allocation5 + $0x80] sm:$0xff]  ;;  %v5887_v4 = vld [vmem:[#allocation5 + $0x90] sm:$0xff] }
 0x1f6   : > { %v1037_v48 = vsub.f32 %v1021_v35, %v5673_v52  ;;  %3640 = vmatmul.mubr.f32.gmra.mrb[34].mxu0 %v1035_v20  ;;  %4281 = vmatprep.subr.bf16.mxu1 %v5251_v12  ;;  %v5874_v20 = vld [vmem:[#allocation2 + $0x88] sm:$0xff] }
 0x1f7   : > { %v1036_v3 = vsub.f32 %v1020_v36, %v5682_v21  ;;  %v3535_v25 = vpop.f32.mrb[22].mxu0  ;;  %3695 = vmatprep.mubr.f32.mxu1 %v1340_v18  ;;  %4251 = vmatpush3.bf16.msra.mxu0 %v5237_v8  ;;  %v5883_v35 = vld [vmem:[#allocation5 + $0x88] sm:$0xff]  ;;  %v6609_v36 = vld [vmem:[#allocation34_spill] sm:$0xff]  ;;  %v5895_v18 = vld [vmem:[#allocation2 + $0xa0] sm:$0xff] }
 0x1f8   : > { %v1023_v32 = vsub.f32 %v3535_v25, %v5690_v50  ;;  %v951_v33 = vpop.f32.mrb[23].mxu0  ;;  %3696 = vmatmul.mubr.f32.gmra.mrb[34].mxu1 %v1341_v24  ;;  %4253 = vmatprep.subr.bf16.mxu0 %v5268_v16  ;;  %v1343_v7 = vadd.f32 %v1037_v48, %v5680_v53  ;;  %v5891_v24 = vld [vmem:[#allocation2 + $0x98] sm:$0xff]  ;;  %v5905_v25 = vld [vmem:[#allocation2 + $0xa8] sm:$0xff] }
 0x1f9   : > { %v1022_v34 = vsub.f32 %v951_v33, %v5696_v47  ;;  %3642 = vmatprep.mubr.f32.mxu0 %v1036_v3  ;;  %4283 = vmatpush3.bf16.msra.mxu1 %v5251_v12  ;;  %v1342_v38 = vadd.f32 %v1036_v3, %v5687_v27  ;;  %v5901_v3 = vld [vmem:[#allocation5 + $0xa0] sm:$0xff]  ;;  %v5909_v33 = vld [vmem:[#allocation2 + $0xb0] sm:$0xff] }
 0x1fa   : > { %v1039_v39 = vsub.f32 %v1023_v32, %v5693_v45  ;;  %3643 = vmatmul.mubr.f32.gmra.mrb[36].mxu0 %v1037_v48  ;;  %4285 = vmatprep.subr.bf16.mxu1 %v5273_v17  ;;  %v5898_v48 = vld [vmem:[#allocation5 + $0x98] sm:$0xff]  ;;  %v6610_v32 = vld [vmem:[#allocation35_spill] sm:$0xff] }
 0x1fb   : > { %v1038_v8 = vsub.f32 %v1022_v34, %v5702_v60  ;;  %v3538_v52 = vpop.f32.mrb[24].mxu0  ;;  %3698 = vmatprep.mubr.f32.mxu1 %v1342_v38  ;;  %4255 = vmatpush3.bf16.msra.mxu0 %v5268_v16  ;;  %v1619_v34 = vld [vmem:[#allocation5 + $0xb0] sm:$0xff]  ;;  %v1603_v38 = vld [vmem:[#allocation2 + $0xb8] sm:$0xff] }
 0x1fc   : > { %v1025_v0 = vsub.f32 %v3538_v52, %v5710_v51  ;;  %v961_v53 = vpop.f32.mrb[25].mxu0  ;;  %3699 = vmatmul.mubr.f32.gmra.mrb[36].mxu1 %v1343_v7  ;;  %4257 = vmatprep.subr.bf16.mxu0 %v5292_v22  ;;  %v1345_v12 = vadd.f32 %v1039_v39, %v5700_v59  ;;  %v1618_v7 = vld [vmem:[#allocation5 + $0xa8] sm:$0xff]  ;;  %v1620_v52 = vld [vmem:[#allocation5 + $0xb8] sm:$0xff] }
 0x1fd   : > { %v1024_v21 = vsub.f32 %v961_v53, %v5716_v26  ;;  %3645 = vmatprep.mubr.f32.mxu0 %v1038_v8  ;;  %4287 = vmatpush3.bf16.msra.mxu1 %v5273_v17  ;;  %v1344_v27 = vadd.f32 %v1038_v8, %v5707_v40  ;;  %v1604_v8 = vld [vmem:[#allocation2 + $0xc0] sm:$0xff]  ;;  %v1605_v53 = vld [vmem:[#allocation2 + $0xc8] sm:$0xff] }
 0x1fe   : > { %v1041_v50 = vsub.f32 %v1025_v0, %v5713_v43  ;;  %3646 = vmatmul.mubr.f32.gmra.mrb[38].mxu0 %v1039_v39  ;;  %4289 = vmatprep.subr.bf16.mxu1 %v5297_v23  ;;  %v6611_v39 = vld [vmem:[#allocation36_spill] sm:$0xff]  ;;  %v1621_v0 = vld [vmem:[#allocation5 + $0xc0] sm:$0xff] }
 0x1ff   : > { %v1040_v16 = vsub.f32 %v1024_v21, %v5722_v9  ;;  %v3541_v45 = vpop.f32.mrb[26].mxu0  ;;  %3701 = vmatprep.mubr.f32.mxu1 %v1344_v27  ;;  %4259 = vmatpush3.bf16.msra.mxu0 %v5292_v22  ;;  %v6598_v9 = vld [vmem:[#allocation27_spill] sm:$0xff]  ;;  %v1606_v21 = vld [vmem:[#allocation2 + $0xd0] sm:$0xff]  ;;  %v1622_v27 = vld [vmem:[#allocation5 + $0xc8] sm:$0xff] }
 0x200   : > { %v1027_v47 = vsub.f32 %v3541_v45, %v5730_v29  ;;  %v971_v59 = vpop.f32.mrb[27].mxu0  ;;  %3702 = vmatmul.mubr.f32.gmra.mrb[38].mxu1 %v1345_v12  ;;  %4261 = vmatprep.subr.bf16.mxu0 %v5322_v30  ;;  %v1347_v17 = vadd.f32 %v1041_v50, %v5720_v6  ;;  %v6612_v12 = vld [vmem:[#allocation37_spill] sm:$0xff]  ;;  %v6613_v45 = vld [vmem:[#allocation38_spill] sm:$0xff] }
 0x201   : > { %v1026_v60 = vsub.f32 %v971_v59, %v5736_v61  ;;  %3648 = vmatprep.mubr.f32.mxu0 %v1040_v16  ;;  %4291 = vmatpush3.bf16.msra.mxu1 %v5297_v23  ;;  %v1346_v40 = vadd.f32 %v1040_v16, %v5727_v44  ;;  %v6599_v61 = vld [vmem:[#allocation28_spill] sm:$0xff]  ;;  %v1607_v16 = vld [vmem:[#allocation2 + $0xd8] sm:$0xff] }
 0x202   : > { %v1043_v51 = vsub.f32 %v1027_v47, %v5733_v58  ;;  %3649 = vmatmul.mubr.f32.gmra.mrb[40].mxu0 %v1041_v50  ;;  %4293 = vmatprep.subr.bf16.mxu1 %v5327_v31  ;;  %v1623_v50 = vld [vmem:[#allocation5 + $0xd0] sm:$0xff]  ;;  %v1608_v47 = vld [vmem:[#allocation2 + $0xe0] sm:$0xff]  ;;  %v1624_v59 = vld [vmem:[#allocation5 + $0xd8] sm:$0xff] }
 0x203   : > { %v1042_v22 = vsub.f32 %v1026_v60, %v5742_v1  ;;  %v3544_v43 = vpop.f32.mrb[28].mxu0  ;;  %3704 = vmatprep.mubr.f32.mxu1 %v1346_v40  ;;  %4263 = vmatpush3.bf16.msra.mxu0 %v5322_v30  ;;  %v1609_v60 = vld [vmem:[#allocation2 + $0xe8] sm:$0xff]  ;;  %v6614_v40 = vld [vmem:[#allocation39_spill] sm:$0xff] }
 0x204   : > { %v1029_v26 = vsub.f32 %v3544_v43, %v5750_v62  ;;  %v981_v6 = vpop.f32.mrb[29].mxu0  ;;  %3705 = vmatmul.mubr.f32.gmra.mrb[40].mxu1 %v1347_v17  ;;  %4265 = vmatprep.subr.bf16.mxu0 %v6598_v9  ;;  %v1349_v23 = vadd.f32 %v1043_v51, %v5740_v56  ;;  %v1625_v17 = vld [vmem:[#allocation5 + $0xe0] sm:$0xff]  ;;  %v1627_v43 = vld [vmem:[#allocation5 + $0xf0] sm:$0xff] }
 0x205   : > { %v1028_v44 = vsub.f32 %v981_v6, %v5756_v10  ;;  %3651 = vmatprep.mubr.f32.mxu0 %v1042_v22  ;;  %4295 = vmatpush3.bf16.msra.mxu1 %v5327_v31  ;;  %v1348_v29 = vadd.f32 %v1042_v22, %v5747_v28  ;;  %v6600_v10 = vld [vmem:[#allocation29_spill] sm:$0xff]  ;;  %v1626_v22 = vld [vmem:[#allocation5 + $0xe8] sm:$0xff]  ;;  %v1611_v6 = vld [vmem:[#allocation2 + $0xf8] sm:$0xff] }
 0x206   : > { %v1045_v58 = vsub.f32 %v1029_v26, %v5753_v5  ;;  %3652 = vmatmul.mubr.f32.gmra.mrb[42].mxu0 %v1043_v51  ;;  %4297 = vmatprep.subr.bf16.mxu1 %v6599_v61  ;;  %v6601_v5 = vld [vmem:[#allocation41_spill] sm:$0xff]  ;;  %v1953_v26 = vadd.f32 %v5876_v46, %v5870_v19 }
 0x207   : > { %v1044_v30 = vsub.f32 %v1028_v44, %v5762_v49  ;;  %v3547_v1 = vpop.f32.mrb[30].mxu0  ;;  %3707 = vmatprep.mubr.f32.mxu1 %v1348_v29  ;;  %4267 = vmatpush3.bf16.msra.mxu0 %v6598_v9  ;;  %v6602_v49 = vld [vmem:[#allocation42_spill] sm:$0xff]  ;;  %v1610_v51 = vld [vmem:[#allocation2 + $0xf0] sm:$0xff]  ;;  %v6615_v9 = vld [vmem:[#allocation40_spill] sm:$0xff]  ;;  %v1954_v44 = vadd.f32 %v5883_v35, %v5874_v20 }
 0x208   : > { %v1031_v56 = vsub.f32 %v3547_v1, %v5770_v11  ;;  %v991_v62 = vpop.f32.mrb[31].mxu0  ;;  %3708 = vmatmul.mubr.f32.gmra.mrb[42].mxu1 %v1349_v23  ;;  %4269 = vmatprep.subr.bf16.mxu0 %v6600_v10  ;;  %v1351_v31 = vadd.f32 %v1045_v58, %v5760_v15  ;;  %v1628_v23 = vld [vmem:[#allocation5 + $0xf8] sm:$0xff]  ;;  %v1959_v1 = vadd.f32 %v1619_v34, %v5909_v33 }
 0x209   : > { %v1030_v28 = vsub.f32 %v991_v62, %v5776_v55  ;;  %3654 = vmatprep.mubr.f32.mxu0 %v1044_v30  ;;  %4299 = vmatpush3.bf16.msra.mxu1 %v6599_v61  ;;  %v1350_v37 = vadd.f32 %v1044_v30, %v6601_v5  ;;  %v6606_v55 = vld [vmem:[#allocation44_spill] sm:$0xff]  ;;  %v1957_v61 = vadd.f32 %v5901_v3, %v5895_v18 }
 0x20a   : > { %v1047_v54 = vsub.f32 %v1031_v56, %v6602_v49  ;;  %3655 = vmatmul.mubr.f32.gmra.mrb[44].mxu0 %v1045_v58  ;;  %4301 = vmatprep.subr.bf16.mxu1 %v6603_v2  ;;  %v1956_v58 = vadd.f32 %v5898_v48, %v5891_v24  ;;  %v1958_v30 = vadd.f32 %v1618_v7, %v5905_v25 }
 0x20b   : > { %v1046_v11 = vsub.f32 %v1030_v28, %v6604_v63  ;;  %3710 = vmatprep.mubr.f32.mxu1 %v1350_v37  ;;  %4271 = vmatpush3.bf16.msra.mxu0 %v6600_v10  ;;  %v1960_v56 = vadd.f32 %v1620_v52, %v1603_v38  ;;  %v1961_v62 = vadd.f32 %v1621_v0, %v1604_v8  ;;  %v1631_v63 = vld [vmem:[#allocation7 + $0x88] sm:$0xff] }
 0x20c   : > { %3711 = vmatmul.mubr.f32.gmra.mrb[44].mxu1 %v1351_v31  ;;  %4273 = vmatprep.subr.bf16.mxu0 %v6605_v13  ;;  %v1353_v15 = vadd.f32 %v1047_v54, %v5780_v57  ;;  %v5879_v57 = vld [vmem:[#allocation2 + $0x90] sm:$0xff]  ;;  %v1962_v10 = vadd.f32 %v1622_v27, %v1605_v53  ;;  %v1963_v31 = vadd.f32 %v1623_v50, %v1606_v21 }
 0x20d   : > { %3657 = vmatprep.mubr.f32.mxu0 %v1046_v11  ;;  %4303 = vmatpush3.bf16.msra.mxu1 %v6603_v2  ;;  %v1352_v14 = vadd.f32 %v1046_v11, %v6606_v55  ;;  %v1955_v29 = vadd.f32 %v5887_v4, %v5879_v57  ;;  %v1964_v28 = vadd.f32 %v1624_v59, %v1607_v16  ;;  %v1630_v2 = vld [vmem:[#allocation7 + $0x80] sm:$0xff] }
 0x20e   : > { %3658 = vmatmul.mubr.f32.gmra.mrb[46].mxu0 %v1047_v54  ;;  %4305 = vmatprep.subr.bf16.mxu1 %v6607_v41  ;;  %v1965_v5 = vadd.f32 %v1625_v17, %v1608_v47  ;;  %v1966_v37 = vadd.f32 %v1626_v22, %v1609_v60  ;;  %v1967_v49 = vadd.f32 %v1627_v43, %v1610_v51 }
 0x20f   : > { %3713 = vmatprep.mubr.f32.mxu1 %v1352_v14  ;;  %4275 = vmatpush3.bf16.msra.mxu0 %v6605_v13  ;;  %v1968_v54 = vadd.f32 %v1628_v23, %v1611_v6  ;;  %v4340_v11 = vpack.c.bf16 %v1631_v63, %v1630_v2  ;;  %v1632_v13 = vld [vmem:[#allocation7 + $0x90] sm:$0xff]  ;;  %v1634_v14 = vld [vmem:[#allocation7 + $0xa0] sm:$0xff] }
 0x210   : > { %3714 = vmatmul.mubr.f32.gmra.mrb[46].mxu1 %v1353_v15  ;;  %3748 = vmatprep.mubr.f32.mxu0 %v5870_v19  ;;  %v1633_v15 = vld [vmem:[#allocation7 + $0x98] sm:$0xff]  ;;  %v1635_v19 = vld [vmem:[#allocation7 + $0xa8] sm:$0xff] }
 0x211   : > { %4307 = vmatpush3.bf16.msra.mxu1 %v6607_v41  ;;  %4309 = vmatprep.subr.bf16.mxu0 %v6608_v42  ;;  %v4344_v55 = vpack.c.bf16 %v1633_v15, %v1632_v13  ;;  %v4348_v41 = vpack.c.bf16 %v1635_v19, %v1634_v14 }
 0x212   : > { %3749 = vmatmul.mubr.f32.vlgmr.msra.gmra.mrb[48].mxu0 %v5874_v20  ;;  %3804 = vmatprep.mubr.f32.mxu1 %v5876_v46  ;;  %v1636_v20 = vld [vmem:[#allocation7 + $0xb0] sm:$0xff]  ;;  %v1637_v46 = vld [vmem:[#allocation7 + $0xb8] sm:$0xff] }
 0x213   : > { %4311 = vmatpush3.bf16.msra.mxu0 %v6608_v42  ;;  %3751 = vmatprep.mubr.f32.mxu0 %v5879_v57  ;;  %v4352_v57 = vpack.c.bf16 %v1637_v46, %v1636_v20  ;;  %v1638_v42 = vld [vmem:[#allocation7 + $0xc0] sm:$0xff] }
 0x214   : > { %3805 = vmatmul.mubr.f32.vlgmr.msra.gmra.mrb[48].mxu1 %v5883_v35  ;;  %4313 = vmatprep.subr.bf16.mxu0 %v6609_v36  ;;  %v1639_v35 = vld [vmem:[#allocation7 + $0xc8] sm:$0xff] }
 0x215   : > { %3807 = vmatprep.mubr.f32.mxu1 %v5887_v4  ;;  %4341 = vmatprep.subr.bf16.mxu1 %v4340_v11  ;;  %v4356_v4 = vpack.c.bf16 %v1639_v35, %v1638_v42 }
 0x216   : > { %3752 = vmatmul.mubr.f32.gmra.mrb[50].mxu0 %v5891_v24  ;;  %4343 = vmatpush3.bf16.msra.mxu1 %v4340_v11  ;;  %v5937_v24 = vld [vmem:[#allocation7 + $0xd0] sm:$0xff] }
 0x217   : > { %4315 = vmatpush3.bf16.msra.mxu0 %v6609_v36  ;;  %3754 = vmatprep.mubr.f32.mxu0 %v5895_v18  ;;  %v1641_v36 = vld [vmem:[#allocation7 + $0xd8] sm:$0xff]  ;;  %v1661_v11 = vld [vmem:[#allocation8 + $0xf0] sm:$0xff] }
 0x218   : > { %3808 = vmatmul.mubr.f32.gmra.mrb[50].mxu1 %v5898_v48  ;;  %4317 = vmatprep.subr.bf16.mxu0 %v6610_v32  ;;  %v4360_v18 = vpack.c.bf16 %v1641_v36, %v5937_v24  ;;  %v5940_v48 = vld [vmem:[#allocation7 + $0xe0] sm:$0xff] }
 0x219   : > { %3810 = vmatprep.mubr.f32.mxu1 %v5901_v3  ;;  %4345 = vmatprep.subr.bf16.mxu1 %v4344_v55  ;;  %v5942_v3 = vld [vmem:[#allocation7 + $0xe8] sm:$0xff] }
 0x21a   : > { %3755 = vmatmul.mubr.f32.gmra.mrb[52].mxu0 %v5905_v25  ;;  %4347 = vmatpush3.bf16.msra.mxu1 %v4344_v55  ;;  %v4364_v25 = vpack.c.bf16 %v5942_v3, %v5940_v48 }
 0x21b   : > { %4319 = vmatpush3.bf16.msra.mxu0 %v6610_v32  ;;  %3757 = vmatprep.mubr.f32.mxu0 %v5909_v33  ;;  %v5946_v32 = vld [vmem:[#allocation7 + $0xf0] sm:$0xff]  ;;  %v5948_v33 = vld [vmem:[#allocation7 + $0xf8] sm:$0xff] }
 0x21c   : > { %3811 = vmatmul.mubr.f32.gmra.mrb[52].mxu1 %v1618_v7  ;;  %4321 = vmatprep.subr.bf16.mxu0 %v6611_v39  ;;  %v4368_v7 = vpack.c.bf16 %v5948_v33, %v5946_v32  ;;  %v2482_v55 = vsub.f32 %v5946_v32, %v1661_v11 }
 0x21d   : > { %3813 = vmatprep.mubr.f32.mxu1 %v1619_v34  ;;  %4349 = vmatprep.subr.bf16.mxu1 %v4348_v41  ;;  %v1647_v34 = vld [vmem:[#allocation8 + $0x80] sm:$0xff] }
 0x21e   : > { %3758 = vmatmul.mubr.f32.gmra.mrb[54].mxu0 %v1603_v38  ;;  %4351 = vmatpush3.bf16.msra.mxu1 %v4348_v41  ;;  %v1648_v38 = vld [vmem:[#allocation8 + $0x88] sm:$0xff] }
 0x21f   : > { %4323 = vmatpush3.bf16.msra.mxu0 %v6611_v39  ;;  %3760 = vmatprep.mubr.f32.mxu0 %v1604_v8  ;;  %v4372_v39 = vpack.c.bf16 %v1648_v38, %v1647_v34  ;;  %v2468_v8 = vsub.f32 %v1630_v2, %v1647_v34 }
 0x220   : > { %3814 = vmatmul.mubr.f32.gmra.mrb[54].mxu1 %v1620_v52  ;;  %4325 = vmatprep.subr.bf16.mxu0 %v6612_v12  ;;  %v2469_v52 = vsub.f32 %v1631_v63, %v1648_v38 }
 0x221   : > { %3816 = vmatprep.mubr.f32.mxu1 %v1621_v0  ;;  %4353 = vmatprep.subr.bf16.mxu1 %v4352_v57 }
 0x222   : > { %3761 = vmatmul.mubr.f32.gmra.mrb[56].mxu0 %v1605_v53  ;;  %4355 = vmatpush3.bf16.msra.mxu1 %v4352_v57  ;;  %v5952_v0 = vpack.c.bf16 %v2469_v52, %v2468_v8  ;;  %v1649_v53 = vld [vmem:[#allocation8 + $0x90] sm:$0xff] }
 0x223   : > { %4327 = vmatpush3.bf16.msra.mxu0 %v6612_v12  ;;  %3763 = vmatprep.mubr.f32.mxu0 %v1606_v21  ;;  %v1650_v12 = vld [vmem:[#allocation8 + $0x98] sm:$0xff] }
 0x224   : > { %3817 = vmatmul.mubr.f32.gmra.mrb[56].mxu1 %v1622_v27  ;;  %4329 = vmatprep.subr.bf16.mxu0 %v6613_v45  ;;  %v4376_v21 = vpack.c.bf16 %v1650_v12, %v1649_v53  ;;  %v2470_v27 = vsub.f32 %v1632_v13, %v1649_v53  ;;  %v1662_v13 = vld [vmem:[#allocation8 + $0xf8] sm:$0xff] }
 0x225   : > { %3819 = vmatprep.mubr.f32.mxu1 %v1623_v50  ;;  %4357 = vmatprep.subr.bf16.mxu1 %v4356_v4  ;;  %v2471_v50 = vsub.f32 %v1633_v15, %v1650_v12  ;;  %v4400_v15 = vpack.c.bf16 %v1662_v13, %v1661_v11 }
 0x226   : > { %3764 = vmatmul.mubr.f32.gmra.mrb[58].mxu0 %v1607_v16  ;;  %4359 = vmatpush3.bf16.msra.mxu1 %v4356_v4 }
 0x227   : > { %4331 = vmatpush3.bf16.msra.mxu0 %v6613_v45  ;;  %3766 = vmatprep.mubr.f32.mxu0 %v1608_v47  ;;  %v5955_v16 = vpack.c.bf16 %v2471_v50, %v2470_v27  ;;  %v1651_v45 = vld [vmem:[#allocation8 + $0xa0] sm:$0xff]  ;;  %v1652_v47 = vld [vmem:[#allocation8 + $0xa8] sm:$0xff] }
 0x228   : > { %3820 = vmatmul.mubr.f32.gmra.mrb[58].mxu1 %v1624_v59  ;;  %4333 = vmatprep.subr.bf16.mxu0 %v6614_v40  ;;  %v4380_v59 = vpack.c.bf16 %v1652_v47, %v1651_v45 }
 0x229   : > { %3822 = vmatprep.mubr.f32.mxu1 %v1625_v17  ;;  %4361 = vmatprep.subr.bf16.mxu1 %v4360_v18  ;;  %v2472_v17 = vsub.f32 %v1634_v14, %v1651_v45  ;;  %v2483_v14 = vsub.f32 %v5948_v33, %v1662_v13 }
 0x22a   : > { %3767 = vmatmul.mubr.f32.gmra.mrb[60].mxu0 %v1609_v60  ;;  %4363 = vmatpush3.bf16.msra.mxu1 %v4360_v18  ;;  %v2473_v60 = vsub.f32 %v1635_v19, %v1652_v47 }
 0x22b   : > { %4335 = vmatpush3.bf16.msra.mxu0 %v6614_v40  ;;  %3769 = vmatprep.mubr.f32.mxu0 %v1610_v51  ;;  %v1653_v51 = vld [vmem:[#allocation8 + $0xb0] sm:$0xff]  ;;  %v5972_v19 = vpack.c.bf16 %v2483_v14, %v2482_v55 }
 0x22c   : > { %3823 = vmatmul.mubr.f32.gmra.mrb[60].mxu1 %v1626_v22  ;;  %4337 = vmatprep.subr.bf16.mxu0 %v6615_v9  ;;  %v5957_v40 = vpack.c.bf16 %v2473_v60, %v2472_v17  ;;  %v1654_v22 = vld [vmem:[#allocation8 + $0xb8] sm:$0xff] }
 0x22d   : > { %3825 = vmatprep.mubr.f32.mxu1 %v1627_v43  ;;  %4365 = vmatprep.subr.bf16.mxu1 %v4364_v25  ;;  %v4384_v43 = vpack.c.bf16 %v1654_v22, %v1653_v51 }
 0x22e   : > { %3770 = vmatmul.mubr.f32.gmra.mrb[62].mxu0 %v1611_v6  ;;  %4367 = vmatpush3.bf16.msra.mxu1 %v4364_v25  ;;  %v2475_v6 = vsub.f32 %v1637_v46, %v1654_v22 }
 0x22f   : > { %4339 = vmatpush3.bf16.msra.mxu0 %v6615_v9  ;;  %3860 = vmatprep.mubr.f32.mxu0 %v1953_v26  ;;  %v2474_v26 = vsub.f32 %v1636_v20, %v1653_v51 }
 0x230   : > { %3826 = vmatmul.mubr.f32.gmra.mrb[62].mxu1 %v1628_v23  ;;  %4369 = vmatprep.subr.bf16.mxu1 %v4368_v7  ;;  %v1655_v23 = vld [vmem:[#allocation8 + $0xc0] sm:$0xff] }
 0x231   : > { %4373 = vmatprep.subr.bf16.mxu0 %v4372_v39  ;;  %v5959_v9 = vpack.c.bf16 %v2475_v6, %v2474_v26 }
 0x232   : > { %3861 = vmatmul.mubr.f32.vlgmr.msra.gmra.mrb[64].mxu0 %v1954_v44  ;;  %4371 = vmatpush3.bf16.msra.mxu1 %v4368_v7  ;;  %v1656_v44 = vld [vmem:[#allocation8 + $0xc8] sm:$0xff] }
 0x233   : > { %3863 = vmatprep.mubr.f32.mxu0 %v1955_v29  ;;  %4375 = vmatpush3.bf16.msra.mxu0 %v4372_v39  ;;  %v4388_v29 = vpack.c.bf16 %v1656_v44, %v1655_v23 }
 0x234   : > { %4405 = vmatprep.subr.bf16.mxu1 %v5952_v0  ;;  %4377 = vmatprep.subr.bf16.mxu0 %v4376_v21 }
 0x236   : > { %3864 = vmatmul.mubr.f32.gmra.mrb[66].mxu0 %v1956_v58  ;;  %v2476_v58 = vsub.f32 %v1638_v42, %v1655_v23 }
 0x237   : > { %3866 = vmatprep.mubr.f32.mxu0 %v1957_v61  ;;  %4379 = vmatpush3.bf16.msra.mxu0 %v4376_v21  ;;  %v2477_v61 = vsub.f32 %v1639_v35, %v1656_v44 }
 0x238   : > { %4381 = vmatprep.subr.bf16.mxu0 %v4380_v59 }
 0x23a   : > { %3867 = vmatmul.mubr.f32.gmra.mrb[68].mxu0 %v1958_v30  ;;  %v5961_v30 = vpack.c.bf16 %v2477_v61, %v2476_v58 }
 0x23b   : > { %3869 = vmatprep.mubr.f32.mxu0 %v1959_v1  ;;  %4383 = vmatpush3.bf16.msra.mxu0 %v4380_v59  ;;  %v1657_v1 = vld [vmem:[#allocation8 + $0xd0] sm:$0xff] }
 0x23c   : > { %4385 = vmatprep.subr.bf16.mxu0 %v4384_v43 }
 0x23e   : > { %3870 = vmatmul.mubr.f32.gmra.mrb[70].mxu0 %v1960_v56  ;;  %v1658_v56 = vld [vmem:[#allocation8 + $0xd8] sm:$0xff] }
 0x23f   : > { %3872 = vmatprep.mubr.f32.mxu0 %v1961_v62  ;;  %4387 = vmatpush3.bf16.msra.mxu0 %v4384_v43  ;;  %v4392_v62 = vpack.c.bf16 %v1658_v56, %v1657_v1 }
 0x240   : > { %4389 = vmatprep.subr.bf16.mxu0 %v4388_v29 }
 0x242   : > { %3873 = vmatmul.mubr.f32.gmra.mrb[72].mxu0 %v1962_v10  ;;  %v2478_v10 = vsub.f32 %v5937_v24, %v1657_v1 }
 0x243   : > { %3875 = vmatprep.mubr.f32.mxu0 %v1963_v31  ;;  %4391 = vmatpush3.bf16.msra.mxu0 %v4388_v29  ;;  %v2479_v31 = vsub.f32 %v1641_v36, %v1658_v56 }
 0x244   : > { %4393 = vmatprep.subr.bf16.mxu0 %v4392_v62 }
 0x246   : > { %3876 = vmatmul.mubr.f32.gmra.mrb[74].mxu0 %v1964_v28  ;;  %v5964_v28 = vpack.c.bf16 %v2479_v31, %v2478_v10 }
 0x247   : > { %3878 = vmatprep.mubr.f32.mxu0 %v1965_v5  ;;  %4395 = vmatpush3.bf16.msra.mxu0 %v4392_v62  ;;  %v1659_v5 = vld [vmem:[#allocation8 + $0xe0] sm:$0xff] }
 0x24a   : > { %3879 = vmatmul.mubr.f32.gmra.mrb[76].mxu0 %v1966_v37  ;;  %v1660_v37 = vld [vmem:[#allocation8 + $0xe8] sm:$0xff] }
 0x24b   : > { %3881 = vmatprep.mubr.f32.mxu0 %v1967_v49  ;;  %v4396_v49 = vpack.c.bf16 %v1660_v37, %v1659_v5  ;;  %v2481_v2 = vsub.f32 %v5942_v3, %v1660_v37 }
 0x24d   : > { %4397 = vmatprep.subr.bf16.mxu0 %v4396_v49 }
 0x24e   : > { %3882 = vmatmul.mubr.f32.gmra.mrb[78].mxu0 %v1968_v54  ;;  %v2480_v54 = vsub.f32 %v5940_v48, %v1659_v5 }
 0x24f   : > { %4399 = vmatpush3.bf16.msra.mxu0 %v4396_v49 }
 0x250   : > { %v5968_v63 = vpack.c.bf16 %v2481_v2, %v2480_v54  ;;  %4401 = vmatprep.subr.bf16.mxu0 %v4400_v15 }
 0x253   : > { %4403 = vmatpush3.bf16.msra.mxu0 %v4400_v15 }
 0x2a4   : > { %v3582_v41 = vpop.f32.mrb[16].mxu1 }
 0x2a5   : > { %v1114_v20 = vpop.f32.mrb[17].mxu1 }
 0x2a8   : > { %v3585_v46 = vpop.f32.mrb[18].mxu1 }
 0x2a9   : > { %v1124_v57 = vpop.f32.mrb[19].mxu1 }
 0x2ac   : > { %v3588_v42 = vpop.f32.mrb[20].mxu1 }
 0x2ad   : > { %v1134_v35 = vpop.f32.mrb[21].mxu1 }
 0x2b0   : > { %v3591_v4 = vpop.f32.mrb[22].mxu1 }
 0x2b1   : > { %v1144_v24 = vpop.f32.mrb[23].mxu1 }
 0x2b4   : > { %v3594_v36 = vpop.f32.mrb[24].mxu1 }
 0x2b5   : > { %v1154_v18 = vpop.f32.mrb[25].mxu1 }
 0x2b8   : > { %v5974_v48 = vpop.f32.mrb[26].mxu1 }
 0x2b9   : > { %v5976_v3 = vpop.f32.mrb[27].mxu1 }
 0x2bc   : > { %v5978_v25 = vpop.f32.mrb[28].mxu1 }
 0x2bd   : > { %v5980_v32 = vpop.f32.mrb[29].mxu1 }
 0x2c0   : > { %v5982_v33 = vpop.f32.mrb[30].mxu1 }
 0x2c1   : > { %v5984_v7 = vpop.f32.mrb[31].mxu1 }
 0x2c5   : > { %v3638_v34 = vpop.f32.mrb[32].mxu0 }
 0x2c6   : > { %v5986_v38 = vadd.f32 %v3638_v34, %v3582_v41  ;;  %v1259_v39 = vpop.f32.mrb[33].mxu0 }
 0x2c7   : > { %v5988_v8 = vadd.f32 %v1259_v39, %v1114_v20  ;;  %v3694_v52 = vpop.f32.mrb[32].mxu1 }
 0x2c8   : > { %v1548_v53 = vsub.f32 %v3694_v52, %v3582_v41  ;;  %v1436_v12 = vpop.f32.mrb[33].mxu1 }
 0x2c9   : > { %v1547_v21 = vsub.f32 %v1436_v12, %v1114_v20  ;;  %v3641_v27 = vpop.f32.mrb[34].mxu0 }
 0x2ca   : > { %v5990_v50 = vadd.f32 %v3638_v34, %v1548_v53  ;;  %v5992_v45 = vadd.f32 %v3641_v27, %v3585_v46  ;;  %v1269_v47 = vpop.f32.mrb[35].mxu0 }
 0x2cb   : > { %v5994_v59 = vadd.f32 %v1547_v21, %v1259_v39  ;;  %v5996_v17 = vadd.f32 %v1269_v47, %v1124_v57  ;;  %v3697_v60 = vpop.f32.mrb[34].mxu1 }
 0x2cc   : > { %v1550_v51 = vsub.f32 %v3697_v60, %v3585_v46  ;;  %v1446_v22 = vpop.f32.mrb[35].mxu1 }
 0x2cd   : > { %v1549_v43 = vsub.f32 %v1446_v22, %v1124_v57  ;;  %v3644_v26 = vpop.f32.mrb[36].mxu0 }
 0x2ce   : > { %v5998_v6 = vadd.f32 %v3641_v27, %v1550_v51  ;;  %v6000_v23 = vadd.f32 %v3644_v26, %v3588_v42  ;;  %v1279_v44 = vpop.f32.mrb[37].mxu0 }
 0x2cf   : > { %v6002_v29 = vadd.f32 %v1549_v43, %v1269_v47  ;;  %v6004_v58 = vadd.f32 %v1279_v44, %v1134_v35  ;;  %v3700_v61 = vpop.f32.mrb[36].mxu1 }
 0x2d0   : > { %6616 = vst [vmem:[#allocation27_spill] sm:$0xff] %v5998_v6  ;;  %6617 = vst [vmem:[#allocation28_spill] sm:$0xff] %v6000_v23  ;;  %v1552_v1 = vsub.f32 %v3700_v61, %v3588_v42  ;;  %v1456_v56 = vpop.f32.mrb[37].mxu1 }
 0x2d1   : > { %6618 = vst [vmem:[#allocation29_spill] sm:$0xff] %v6002_v29  ;;  %6619 = vst [vmem:[#allocation41_spill] sm:$0xff] %v6004_v58  ;;  %v1551_v62 = vsub.f32 %v1456_v56, %v1134_v35  ;;  %v3647_v10 = vpop.f32.mrb[38].mxu0 }
 0x2d2   : > { %v6006_v31 = vadd.f32 %v3644_v26, %v1552_v1  ;;  %v6008_v5 = vadd.f32 %v3647_v10, %v3591_v4  ;;  %v1289_v37 = vpop.f32.mrb[39].mxu0 }
 0x2d3   : > { %v6010_v49 = vadd.f32 %v1551_v62, %v1279_v44  ;;  %v6012_v54 = vadd.f32 %v1289_v37, %v1144_v24  ;;  %v3703_v2 = vpop.f32.mrb[38].mxu1 }
 0x2d4   : > { %6620 = vst [vmem:[#allocation42_spill] sm:$0xff] %v6006_v31  ;;  %6621 = vst [vmem:[#allocation30_spill] sm:$0xff] %v6008_v5  ;;  %v1554_v11 = vsub.f32 %v3703_v2, %v3591_v4  ;;  %v1466_v13 = vpop.f32.mrb[39].mxu1 }
 0x2d5   : > { %6622 = vst [vmem:[#allocation43_spill] sm:$0xff] %v6010_v49  ;;  %6623 = vst [vmem:[#allocation31_spill] sm:$0xff] %v6012_v54  ;;  %v1553_v15 = vsub.f32 %v1466_v13, %v1144_v24  ;;  %v3650_v55 = vpop.f32.mrb[40].mxu0 }
 0x2d6   : > { %v6014_v14 = vadd.f32 %v3647_v10, %v1554_v11  ;;  %v6016_v41 = vadd.f32 %v3650_v55, %v3594_v36  ;;  %v1299_v20 = vpop.f32.mrb[41].mxu0 }
 0x2d7   : > { %v6018_v46 = vadd.f32 %v1553_v15, %v1289_v37  ;;  %v6020_v57 = vadd.f32 %v1299_v20, %v1154_v18  ;;  %v3706_v42 = vpop.f32.mrb[40].mxu1 }
 0x2d8   : > { %6624 = vst [vmem:[#allocation44_spill] sm:$0xff] %v6014_v14  ;;  %6625 = vst [vmem:[#allocation32_spill] sm:$0xff] %v6016_v41  ;;  %v1556_v35 = vsub.f32 %v3706_v42, %v3594_v36  ;;  %v1476_v34 = vpop.f32.mrb[41].mxu1 }
 0x2d9   : > { %6626 = vst [vmem:[#allocation33_spill] sm:$0xff] %v6018_v46  ;;  %6627 = vst [vmem:[#allocation34_spill] sm:$0xff] %v6020_v57  ;;  %v1555_v39 = vsub.f32 %v1476_v34, %v1154_v18  ;;  %v3653_v52 = vpop.f32.mrb[42].mxu0 }
 0x2da   : > { %v6022_v53 = vadd.f32 %v3650_v55, %v1556_v35  ;;  %v6025_v4 = vadd.f32 %v3653_v52, %v5974_v48  ;;  %v1309_v24 = vpop.f32.mrb[43].mxu0 }
 0x2db   : > { %v6027_v12 = vadd.f32 %v1555_v39, %v1299_v20  ;;  %v6030_v21 = vadd.f32 %v1309_v24, %v5976_v3  ;;  %v3709_v27 = vpop.f32.mrb[42].mxu1 }
 0x2dc   : > { %6628 = vst [vmem:[#allocation35_spill] sm:$0xff] %v6022_v53  ;;  %6629 = vst [vmem:[#allocation36_spill] sm:$0xff] %v6025_v4  ;;  %v1558_v47 = vsub.f32 %v3709_v27, %v5974_v48  ;;  %v1486_v60 = vpop.f32.mrb[43].mxu1 }
 0x2dd   : > { %6630 = vst [vmem:[#allocation37_spill] sm:$0xff] %v6027_v12  ;;  %6631 = vst [vmem:[#allocation38_spill] sm:$0xff] %v6030_v21  ;;  %v1557_v36 = vsub.f32 %v1486_v60, %v5976_v3  ;;  %v3656_v51 = vpop.f32.mrb[44].mxu0 }
 0x2de   : > { %v6034_v18 = vadd.f32 %v3653_v52, %v1558_v47  ;;  %v6037_v22 = vadd.f32 %v3656_v51, %v5978_v25  ;;  %v1319_v43 = vpop.f32.mrb[45].mxu0 }
 0x2df   : > { %v6039_v26 = vadd.f32 %v1557_v36, %v1309_v24  ;;  %v6042_v44 = vadd.f32 %v1319_v43, %v5980_v32  ;;  %v3712_v61 = vpop.f32.mrb[44].mxu1 }
 0x2e0   : > { %6632 = vst [vmem:[#allocation39_spill] sm:$0xff] %v6034_v18  ;;  %6633 = vst [vmem:[#allocation40_spill] sm:$0xff] %v6037_v22  ;;  %v1560_v1 = vsub.f32 %v3712_v61, %v5978_v25  ;;  %v1496_v56 = vpop.f32.mrb[45].mxu1 }
 0x2e1   : > { %6634 = vst [vmem:[#allocation45_spill] sm:$0xff] %v6039_v26  ;;  %6635 = vst [vmem:[#allocation46_spill] sm:$0xff] %v6042_v44  ;;  %v1559_v48 = vsub.f32 %v1496_v56, %v5980_v32  ;;  %v3659_v62 = vpop.f32.mrb[46].mxu0 }
 0x2e2   : > { %v6046_v3 = vadd.f32 %v3656_v51, %v1560_v1  ;;  %v6049_v10 = vadd.f32 %v3659_v62, %v5982_v33  ;;  %v1329_v37 = vpop.f32.mrb[47].mxu0 }
 0x2e3   : > { %v6051_v2 = vadd.f32 %v1559_v48, %v1319_v43  ;;  %v6054_v11 = vadd.f32 %v1329_v37, %v5984_v7  ;;  %v3715_v13 = vpop.f32.mrb[46].mxu1 }
 0x2e4   : > { %6636 = vst [vmem:[#allocation47_spill] sm:$0xff] %v6046_v3  ;;  %6637 = vst [vmem:[#allocation48_spill] sm:$0xff] %v6049_v10  ;;  %v1562_v15 = vsub.f32 %v3715_v13, %v5982_v33  ;;  %v1506_v55 = vpop.f32.mrb[47].mxu1 }
 0x2e5   : > { %6638 = vst [vmem:[#allocation49_spill] sm:$0xff] %v6051_v2  ;;  %6639 = vst [vmem:[#allocation50_spill] sm:$0xff] %v6054_v11  ;;  %v1561_v25 = vsub.f32 %v1506_v55, %v5984_v7  ;;  %v6058_v20 = vpop.f32.mrb[48].mxu0 }
 0x2e6   : > { %v6060_v32 = vadd.f32 %v3659_v62, %v1562_v15  ;;  %v6062_v42 = vpop.f32.mrb[49].mxu0 }
 0x2e7   : > { %v6064_v35 = vadd.f32 %v1561_v25, %v1329_v37  ;;  %v6066_v34 = vpop.f32.mrb[48].mxu1 }
 0x2e8   : > { %6640 = vst [vmem:[#allocation51_spill] sm:$0xff] %v6060_v32  ;;  %v6070_v39 = vsub.f32 %v6058_v20, %v6066_v34  ;;  %v6072_v52 = vpop.f32.mrb[49].mxu1 }
 0x2e9   : > { %6641 = vst [vmem:[#allocation52_spill] sm:$0xff] %v6064_v35  ;;  %v6076_v33 = vsub.f32 %v6062_v42, %v6072_v52  ;;  %v6078_v7 = vpop.f32.mrb[50].mxu0 }
 0x2ea   : > { %v6080_v24 = vpop.f32.mrb[51].mxu0 }
 0x2eb   : > { %v6082_v27 = vpop.f32.mrb[50].mxu1  ;;  %3916 = vmatprep.mubr.f32.mxu1 %v6076_v33 }
 0x2ec   : > { %v6087_v47 = vsub.f32 %v6078_v7, %v6082_v27  ;;  %v6089_v60 = vpop.f32.mrb[51].mxu1  ;;  %3917 = vmatmul.mubr.f32.vlgmr.msra.gmra.mrb[64].mxu1 %v6070_v39 }
 0x2ed   : > { %v6094_v36 = vsub.f32 %v6080_v24, %v6089_v60  ;;  %v6096_v51 = vpop.f32.mrb[52].mxu0  ;;  %4407 = vmatpush3.bf16.msra.mxu1 %v5952_v0 }
 0x2ee   : > { %v6099_v43 = vpop.f32.mrb[53].mxu0  ;;  %4409 = vmatprep.subr.bf16.mxu1 %v5955_v16 }
 0x2ef   : > { %v6102_v61 = vpop.f32.mrb[52].mxu1  ;;  %3919 = vmatprep.mubr.f32.mxu1 %v6094_v36 }
 0x2f0   : > { %v6107_v1 = vsub.f32 %v6096_v51, %v6102_v61  ;;  %v6109_v56 = vpop.f32.mrb[53].mxu1  ;;  %3920 = vmatmul.mubr.f32.gmra.mrb[66].mxu1 %v6087_v47 }
 0x2f1   : > { %v6114_v48 = vsub.f32 %v6099_v43, %v6109_v56  ;;  %v6116_v0 = vpop.f32.mrb[54].mxu0  ;;  %4411 = vmatpush3.bf16.msra.mxu1 %v5955_v16 }
 0x2f2   : > { %v6119_v62 = vpop.f32.mrb[55].mxu0  ;;  %4413 = vmatprep.subr.bf16.mxu1 %v5957_v40 }
 0x2f3   : > { %v6122_v37 = vpop.f32.mrb[54].mxu1  ;;  %3922 = vmatprep.mubr.f32.mxu1 %v6114_v48 }
 0x2f4   : > { %v6127_v13 = vsub.f32 %v6116_v0, %v6122_v37  ;;  %v6129_v15 = vpop.f32.mrb[55].mxu1  ;;  %3923 = vmatmul.mubr.f32.gmra.mrb[68].mxu1 %v6107_v1 }
 0x2f5   : > { %v6134_v55 = vsub.f32 %v6119_v62, %v6129_v15  ;;  %v6136_v16 = vpop.f32.mrb[56].mxu0  ;;  %4415 = vmatpush3.bf16.msra.mxu1 %v5957_v40 }
 0x2f6   : > { %v6139_v25 = vpop.f32.mrb[57].mxu0  ;;  %4417 = vmatprep.subr.bf16.mxu1 %v5959_v9 }
 0x2f7   : > { %v6142_v35 = vpop.f32.mrb[56].mxu1  ;;  %3925 = vmatprep.mubr.f32.mxu1 %v6134_v55 }
 0x2f8   : > { %v6147_v32 = vsub.f32 %v6136_v16, %v6142_v35  ;;  %v6149_v11 = vpop.f32.mrb[57].mxu1  ;;  %3926 = vmatmul.mubr.f32.gmra.mrb[70].mxu1 %v6127_v13 }
 0x2f9   : > { %v6154_v2 = vsub.f32 %v6139_v25, %v6149_v11  ;;  %v6156_v40 = vpop.f32.mrb[58].mxu0  ;;  %4419 = vmatpush3.bf16.msra.mxu1 %v5959_v9 }
 0x2fa   : > { %v6159_v10 = vpop.f32.mrb[59].mxu0  ;;  %4421 = vmatprep.subr.bf16.mxu1 %v5961_v30 }
 0x2fb   : > { %v6162_v3 = vpop.f32.mrb[58].mxu1  ;;  %3928 = vmatprep.mubr.f32.mxu1 %v6154_v2 }
 0x2fc   : > { %v6167_v44 = vsub.f32 %v6156_v40, %v6162_v3  ;;  %v6169_v26 = vpop.f32.mrb[59].mxu1  ;;  %3929 = vmatmul.mubr.f32.gmra.mrb[72].mxu1 %v6147_v32 }
 0x2fd   : > { %v6174_v22 = vsub.f32 %v6159_v10, %v6169_v26  ;;  %v6176_v9 = vpop.f32.mrb[60].mxu0  ;;  %4423 = vmatpush3.bf16.msra.mxu1 %v5961_v30 }
 0x2fe   : > { %v6179_v18 = vpop.f32.mrb[61].mxu0  ;;  %4425 = vmatprep.subr.bf16.mxu1 %v5964_v28 }
 0x2ff   : > { %v6182_v21 = vpop.f32.mrb[60].mxu1  ;;  %3931 = vmatprep.mubr.f32.mxu1 %v6174_v22 }
 0x300   : > { %v6187_v12 = vsub.f32 %v6176_v9, %v6182_v21  ;;  %v6189_v4 = vpop.f32.mrb[61].mxu1  ;;  %3932 = vmatmul.mubr.f32.gmra.mrb[74].mxu1 %v6167_v44 }
 0x301   : > { %v6194_v53 = vsub.f32 %v6179_v18, %v6189_v4  ;;  %v6196_v30 = vpop.f32.mrb[62].mxu0  ;;  %4427 = vmatpush3.bf16.msra.mxu1 %v5964_v28 }
 0x302   : > { %v6199_v57 = vpop.f32.mrb[63].mxu0  ;;  %4429 = vmatprep.subr.bf16.mxu1 %v5968_v63 }
 0x303   : > { %v6202_v46 = vpop.f32.mrb[62].mxu1  ;;  %3934 = vmatprep.mubr.f32.mxu1 %v6194_v53 }
 0x304   : > { %v6207_v41 = vsub.f32 %v6196_v30, %v6202_v46  ;;  %v6209_v14 = vpop.f32.mrb[63].mxu1  ;;  %3935 = vmatmul.mubr.f32.gmra.mrb[76].mxu1 %v6187_v12 }
 0x305   : > { %v6214_v54 = vsub.f32 %v6199_v57, %v6209_v14  ;;  %v3862_v28 = vpop.f32.mrb[64].mxu0  ;;  %4431 = vmatpush3.bf16.msra.mxu1 %v5968_v63 }
 0x306   : > { %v2131_v49 = vsub.f32 %v3862_v28, %v6058_v20  ;;  %v2035_v5 = vpop.f32.mrb[65].mxu0  ;;  %4433 = vmatprep.subr.bf16.mxu1 %v5972_v19 }
 0x307   : > { %v2130_v31 = vsub.f32 %v2035_v5, %v6062_v42  ;;  %3937 = vmatprep.mubr.f32.mxu1 %v6214_v54 }
 0x308   : > { %v2147_v58 = vsub.f32 %v2131_v49, %v6066_v34  ;;  %3938 = vmatmul.mubr.f32.gmra.mrb[78].mxu1 %v6207_v41 }
 0x309   : > { %v2146_v29 = vsub.f32 %v2130_v31, %v6072_v52  ;;  %v3865_v23 = vpop.f32.mrb[66].mxu0  ;;  %4435 = vmatpush3.bf16.msra.mxu1 %v5972_v19 }
 0x30a   : > { %v2453_v63 = vadd.f32 %v2147_v58, %v6070_v39  ;;  %v2133_v20 = vsub.f32 %v3865_v23, %v6078_v7  ;;  %v2045_v28 = vpop.f32.mrb[67].mxu0 }
 0x30b   : > { %v2132_v6 = vsub.f32 %v2045_v28, %v6080_v24  ;;  %3972 = vmatprep.mubr.f32.mxu0 %v2146_v29  ;;  %v2452_v5 = vadd.f32 %v2146_v29, %v6076_v33 }
 0x30c   : > { %v2149_v42 = vsub.f32 %v2133_v20, %v6082_v27  ;;  %3973 = vmatmul.mubr.f32.vlgmr.msra.gmra.mrb[80].mxu0 %v2147_v58 }
 0x30d   : > { %v2148_v49 = vsub.f32 %v2132_v6, %v6089_v60  ;;  %v3868_v34 = vpop.f32.mrb[68].mxu0  ;;  %4028 = vmatprep.mubr.f32.mxu1 %v2452_v5 }
 0x30e   : > { %v2135_v31 = vsub.f32 %v3868_v34, %v6096_v51  ;;  %v2055_v19 = vpop.f32.mrb[69].mxu0  ;;  %4029 = vmatmul.mubr.f32.vlgmr.msra.gmra.mrb[80].mxu1 %v2453_v63  ;;  %v2455_v39 = vadd.f32 %v2149_v42, %v6087_v47 }
 0x30f   : > { %v2134_v23 = vsub.f32 %v2055_v19, %v6099_v43  ;;  %3975 = vmatprep.mubr.f32.mxu0 %v2148_v49  ;;  %v2454_v52 = vadd.f32 %v2148_v49, %v6094_v36 }
 0x310   : > { %v2151_v29 = vsub.f32 %v2135_v31, %v6102_v61  ;;  %3976 = vmatmul.mubr.f32.gmra.mrb[82].mxu0 %v2149_v42 }
 0x311   : > { %v2150_v58 = vsub.f32 %v2134_v23, %v6109_v56  ;;  %v3871_v33 = vpop.f32.mrb[70].mxu0  ;;  %4031 = vmatprep.mubr.f32.mxu1 %v2454_v52 }
 0x312   : > { %v2137_v6 = vsub.f32 %v3871_v33, %v6116_v0  ;;  %v2065_v7 = vpop.f32.mrb[71].mxu0  ;;  %4032 = vmatmul.mubr.f32.gmra.mrb[82].mxu1 %v2455_v39  ;;  %v2457_v24 = vadd.f32 %v2151_v29, %v6107_v1 }
 0x313   : > { %v2136_v27 = vsub.f32 %v2065_v7, %v6119_v62  ;;  %3978 = vmatprep.mubr.f32.mxu0 %v2150_v58  ;;  %v2456_v47 = vadd.f32 %v2150_v58, %v6114_v48 }
 0x314   : > { %v2153_v60 = vsub.f32 %v2137_v6, %v6122_v37  ;;  %3979 = vmatmul.mubr.f32.gmra.mrb[84].mxu0 %v2151_v29 }
 0x315   : > { %v2152_v36 = vsub.f32 %v2136_v27, %v6129_v15  ;;  %v3874_v51 = vpop.f32.mrb[72].mxu0  ;;  %4034 = vmatprep.mubr.f32.mxu1 %v2456_v47 }
 0x316   : > { %v2139_v43 = vsub.f32 %v3874_v51, %v6136_v16  ;;  %v2075_v61 = vpop.f32.mrb[73].mxu0  ;;  %4035 = vmatmul.mubr.f32.gmra.mrb[84].mxu1 %v2457_v24  ;;  %v2459_v56 = vadd.f32 %v2153_v60, %v6127_v13 }
 0x317   : > { %v2138_v1 = vsub.f32 %v2075_v61, %v6139_v25  ;;  %3981 = vmatprep.mubr.f32.mxu0 %v2152_v36  ;;  %v2458_v0 = vadd.f32 %v2152_v36, %v6134_v55 }
 0x318   : > { %v2155_v48 = vsub.f32 %v2139_v43, %v6142_v35  ;;  %3982 = vmatmul.mubr.f32.gmra.mrb[86].mxu0 %v2153_v60 }
 0x319   : > { %v2154_v62 = vsub.f32 %v2138_v1, %v6149_v11  ;;  %v3877_v37 = vpop.f32.mrb[74].mxu0  ;;  %4037 = vmatprep.mubr.f32.mxu1 %v2458_v0 }
 0x31a   : > { %v2141_v15 = vsub.f32 %v3877_v37, %v6156_v40  ;;  %v2085_v63 = vpop.f32.mrb[75].mxu0  ;;  %4038 = vmatmul.mubr.f32.gmra.mrb[86].mxu1 %v2459_v56  ;;  %v2461_v16 = vadd.f32 %v2155_v48, %v6147_v32 }
 0x31b   : > { %v2140_v13 = vsub.f32 %v2085_v63, %v6159_v10  ;;  %3984 = vmatprep.mubr.f32.mxu0 %v2154_v62  ;;  %v2460_v25 = vadd.f32 %v2154_v62, %v6154_v2 }
 0x31c   : > { %v2157_v55 = vsub.f32 %v2141_v15, %v6162_v3  ;;  %3985 = vmatmul.mubr.f32.gmra.mrb[88].mxu0 %v2155_v48 }
 0x31d   : > { %v2156_v35 = vsub.f32 %v2140_v13, %v6169_v26  ;;  %v3880_v20 = vpop.f32.mrb[76].mxu0  ;;  %4040 = vmatprep.mubr.f32.mxu1 %v2460_v25 }
 0x31e   : > { %v2143_v11 = vsub.f32 %v3880_v20, %v6176_v9  ;;  %v2095_v28 = vpop.f32.mrb[77].mxu0  ;;  %4041 = vmatmul.mubr.f32.gmra.mrb[88].mxu1 %v2461_v16  ;;  %v2463_v40 = vadd.f32 %v2157_v55, %v6167_v44 }
 0x31f   : > { %v2142_v32 = vsub.f32 %v2095_v28, %v6179_v18  ;;  %3987 = vmatprep.mubr.f32.mxu0 %v2156_v35  ;;  %v2462_v10 = vadd.f32 %v2156_v35, %v6174_v22 }
 0x320   : > { %v2159_v2 = vsub.f32 %v2143_v11, %v6182_v21  ;;  %3988 = vmatmul.mubr.f32.gmra.mrb[90].mxu0 %v2157_v55  ;;  %v6642_v11 = vld [vmem:[#allocation27_spill] sm:$0xff] }
 0x321   : > { %v2158_v3 = vsub.f32 %v2142_v32, %v6189_v4  ;;  %v3883_v5 = vpop.f32.mrb[78].mxu0  ;;  %4043 = vmatprep.mubr.f32.mxu1 %v2462_v10 }
 0x322   : > { %v2145_v26 = vsub.f32 %v3883_v5, %v6196_v30  ;;  %v2105_v42 = vpop.f32.mrb[79].mxu0  ;;  %4044 = vmatmul.mubr.f32.gmra.mrb[90].mxu1 %v2463_v40  ;;  %v2465_v9 = vadd.f32 %v2159_v2, %v6187_v12  ;;  %v6643_v40 = vld [vmem:[#allocation28_spill] sm:$0xff] }
 0x323   : > { %v2144_v44 = vsub.f32 %v2105_v42, %v6199_v57  ;;  %3990 = vmatprep.mubr.f32.mxu0 %v2158_v3  ;;  %v2464_v18 = vadd.f32 %v2158_v3, %v6194_v53  ;;  %v6644_v3 = vld [vmem:[#allocation29_spill] sm:$0xff] }
 0x324   : > { %v2161_v22 = vsub.f32 %v2145_v26, %v6202_v46  ;;  %3991 = vmatmul.mubr.f32.gmra.mrb[92].mxu0 %v2159_v2  ;;  %v6645_v26 = vld [vmem:[#allocation41_spill] sm:$0xff] }
 0x325   : > { %v2160_v21 = vsub.f32 %v2144_v44, %v6209_v14  ;;  %4046 = vmatprep.mubr.f32.mxu1 %v2464_v18 }
 0x326   : > { %4047 = vmatmul.mubr.f32.gmra.mrb[92].mxu1 %v2465_v9  ;;  %v2467_v4 = vadd.f32 %v2161_v22, %v6207_v41 }
 0x327   : > { %3993 = vmatprep.mubr.f32.mxu0 %v2160_v21  ;;  %v2466_v30 = vadd.f32 %v2160_v21, %v6214_v54 }
 0x328   : > { %3994 = vmatmul.mubr.f32.gmra.mrb[94].mxu0 %v2161_v22 }
 0x329   : > { %4049 = vmatprep.mubr.f32.mxu1 %v2466_v30 }
 0x32a   : > { %4050 = vmatmul.mubr.f32.gmra.mrb[94].mxu1 %v2467_v4 }
 0x3bf   : > { %v3918_v12 = vpop.f32.mrb[64].mxu1 }
 0x3c0   : > { %v2228_v57 = vpop.f32.mrb[65].mxu1 }
 0x3c3   : > { %v3921_v49 = vpop.f32.mrb[66].mxu1 }
 0x3c4   : > { %v2238_v34 = vpop.f32.mrb[67].mxu1 }
 0x3c7   : > { %v3924_v53 = vpop.f32.mrb[68].mxu1 }
 0x3c8   : > { %v6269_v31 = vpop.f32.mrb[69].mxu1 }
 0x3cb   : > { %v6271_v46 = vpop.f32.mrb[70].mxu1 }
 0x3cc   : > { %v6273_v14 = vpop.f32.mrb[71].mxu1 }
 0x3cf   : > { %v6275_v19 = vpop.f32.mrb[72].mxu1 }
 0x3d0   : > { %v6277_v41 = vpop.f32.mrb[73].mxu1 }
 0x3d3   : > { %v6279_v39 = vpop.f32.mrb[74].mxu1 }
 0x3d4   : > { %v6281_v54 = vpop.f32.mrb[75].mxu1 }
 0x3d7   : > { %v6283_v23 = vpop.f32.mrb[76].mxu1 }
 0x3d8   : > { %v6285_v52 = vpop.f32.mrb[77].mxu1 }
 0x3db   : > { %v6287_v29 = vpop.f32.mrb[78].mxu1 }
 0x3dc   : > { %v6289_v58 = vpop.f32.mrb[79].mxu1 }
 0x3df   : > { %v3974_v33 = vpop.f32.mrb[80].mxu0 }
 0x3e0   : > { %v2630_v6 = vadd.f32 %v3974_v33, %v3918_v12  ;;  %v2373_v7 = vpop.f32.mrb[81].mxu0 }
 0x3e1   : > { %v2629_v24 = vadd.f32 %v2373_v7, %v2228_v57  ;;  %v4030_v27 = vpop.f32.mrb[80].mxu1 }
 0x3e2   : > { %v2646_v47 = vadd.f32 %v2630_v6, %v5986_v38  ;;  %v2662_v60 = vsub.f32 %v4030_v27, %v3918_v12  ;;  %v2550_v36 = vpop.f32.mrb[81].mxu1  ;;  %v6648_v6 = vld [vmem:[#allocation43_spill] sm:$0xff] }
 0x3e3   : > { %v2645_v51 = vadd.f32 %v2629_v24, %v5988_v8  ;;  %v2661_v43 = vsub.f32 %v2550_v36, %v2228_v57  ;;  %v3977_v61 = vpop.f32.mrb[82].mxu0  ;;  %v6646_v57 = vld [vmem:[#allocation42_spill] sm:$0xff]  ;;  %v6649_v24 = vld [vmem:[#allocation31_spill] sm:$0xff] }
 0x3e4   : > { %2710 = vst [vmem:[%s6294_s9 + $0x8] sm:$0xff] %v2646_v47  ;;  %v2678_v56 = vadd.f32 %v3974_v33, %v2662_v60  ;;  %v2632_v1 = vadd.f32 %v3977_v61, %v3921_v49  ;;  %v2383_v0 = vpop.f32.mrb[83].mxu0 }
 0x3e5   : > { %2709 = vst [vmem:[%s6294_s9] sm:$0xff] %v2645_v51  ;;  %v2677_v48 = vadd.f32 %v2661_v43, %v2373_v7  ;;  %v2631_v62 = vadd.f32 %v2383_v0, %v2238_v34  ;;  %v4033_v38 = vpop.f32.mrb[82].mxu1 }
 0x3e6   : > { %v2694_v37 = vadd.f32 %v2678_v56, %v5990_v50  ;;  %v2648_v8 = vadd.f32 %v2632_v1, %v5992_v45  ;;  %v2664_v15 = vsub.f32 %v4033_v38, %v3921_v49  ;;  %v2560_v63 = vpop.f32.mrb[83].mxu1  ;;  %v6650_v1 = vld [vmem:[#allocation44_spill] sm:$0xff] }
 0x3e7   : > { %v2693_v16 = vadd.f32 %v2677_v48, %v5994_v59  ;;  %v2647_v13 = vadd.f32 %v2631_v62, %v5996_v17  ;;  %v2663_v25 = vsub.f32 %v2560_v63, %v2238_v34  ;;  %v3980_v55 = vpop.f32.mrb[84].mxu0  ;;  %v6647_v34 = vld [vmem:[#allocation30_spill] sm:$0xff] }
 0x3e8   : > { %2726 = vst [vmem:[%s6303_s22 + $0x8] sm:$0xff] %v2694_v37  ;;  %2712 = vst [vmem:[%s6294_s9 + $0x18] sm:$0xff] %v2648_v8  ;;  %v2680_v35 = vadd.f32 %v3977_v61, %v2664_v15  ;;  %v2634_v20 = vadd.f32 %v3980_v55, %v3924_v53  ;;  %v2393_v50 = vpop.f32.mrb[85].mxu0  ;;  %v6652_v37 = vld [vmem:[#allocation33_spill] sm:$0xff]  ;;  %v6653_v15 = vld [vmem:[#allocation34_spill] sm:$0xff] }
 0x3e9   : > { %2725 = vst [vmem:[%s6303_s22] sm:$0xff] %v2693_v16  ;;  %2711 = vst [vmem:[%s6294_s9 + $0x10] sm:$0xff] %v2647_v13  ;;  %v2679_v45 = vadd.f32 %v2663_v25, %v2383_v0  ;;  %v2633_v59 = vadd.f32 %v2393_v50, %v6269_v31  ;;  %v4036_v17 = vpop.f32.mrb[84].mxu1 }
 0x3ea   : > { %v2696_v28 = vadd.f32 %v2680_v35, %v6642_v11  ;;  %v2650_v32 = vadd.f32 %v2634_v20, %v6643_v40  ;;  %v2666_v10 = vsub.f32 %v4036_v17, %v3924_v53  ;;  %v2570_v2 = vpop.f32.mrb[85].mxu1  ;;  %v6656_v40 = vld [vmem:[#allocation37_spill] sm:$0xff] }
 0x3eb   : > { %v2695_v5 = vadd.f32 %v2679_v45, %v6644_v3  ;;  %v2649_v42 = vadd.f32 %v2633_v59, %v6645_v26  ;;  %v2665_v9 = vsub.f32 %v2570_v2, %v6269_v31  ;;  %v3983_v44 = vpop.f32.mrb[86].mxu0  ;;  %v6654_v45 = vld [vmem:[#allocation35_spill] sm:$0xff] }
 0x3ec   : > { %2728 = vst [vmem:[%s6303_s22 + $0x18] sm:$0xff] %v2696_v28  ;;  %2714 = vst [vmem:[%s6294_s9 + $0x28] sm:$0xff] %v2650_v32  ;;  %v2682_v18 = vadd.f32 %v3980_v55, %v2666_v10  ;;  %v2636_v22 = vadd.f32 %v3983_v44, %v6271_v46  ;;  %v2403_v21 = vpop.f32.mrb[87].mxu0  ;;  %v6657_v10 = vld [vmem:[#allocation38_spill] sm:$0xff] }
 0x3ed   : > { %2727 = vst [vmem:[%s6303_s22 + $0x10] sm:$0xff] %v2695_v5  ;;  %2713 = vst [vmem:[%s6294_s9 + $0x20] sm:$0xff] %v2649_v42  ;;  %v2681_v4 = vadd.f32 %v2665_v9, %v2393_v50  ;;  %v2635_v30 = vadd.f32 %v2403_v21, %v6273_v14  ;;  %v4039_v12 = vpop.f32.mrb[86].mxu1 }
 0x3ee   : > { %v2698_v49 = vadd.f32 %v2682_v18, %v6646_v57  ;;  %v2652_v53 = vadd.f32 %v2636_v22, %v6647_v34  ;;  %v2668_v31 = vsub.f32 %v4039_v12, %v6271_v46  ;;  %v2580_v33 = vpop.f32.mrb[87].mxu1  ;;  %v6658_v22 = vld [vmem:[#allocation39_spill] sm:$0xff]  ;;  %v6660_v57 = vld [vmem:[#allocation45_spill] sm:$0xff]  ;;  %v6661_v34 = vld [vmem:[#allocation46_spill] sm:$0xff] }
 0x3ef   : > { %v2697_v7 = vadd.f32 %v2681_v4, %v6648_v6  ;;  %v2651_v27 = vadd.f32 %v2635_v30, %v6649_v24  ;;  %v2667_v47 = vsub.f32 %v2580_v33, %v6273_v14  ;;  %v3986_v60 = vpop.f32.mrb[88].mxu0  ;;  %v6651_v14 = vld [vmem:[#allocation32_spill] sm:$0xff] }
 0x3f0   : > { %2730 = vst [vmem:[%s6303_s22 + $0x28] sm:$0xff] %v2698_v49  ;;  %2716 = vst [vmem:[%s6294_s9 + $0x38] sm:$0xff] %v2652_v53  ;;  %v2684_v36 = vadd.f32 %v3983_v44, %v2668_v31  ;;  %v2638_v51 = vadd.f32 %v3986_v60, %v6275_v19  ;;  %v2413_v43 = vpop.f32.mrb[89].mxu0 }
 0x3f1   : > { %2729 = vst [vmem:[%s6303_s22 + $0x20] sm:$0xff] %v2697_v7  ;;  %2715 = vst [vmem:[%s6294_s9 + $0x30] sm:$0xff] %v2651_v27  ;;  %v2683_v61 = vadd.f32 %v2667_v47, %v2403_v21  ;;  %v2637_v46 = vadd.f32 %v2413_v43, %v6277_v41  ;;  %v4042_v56 = vpop.f32.mrb[88].mxu1  ;;  %v6659_v21 = vld [vmem:[#allocation40_spill] sm:$0xff]  ;;  %v6662_v47 = vld [vmem:[#allocation47_spill] sm:$0xff] }
 0x3f2   : > { %v2700_v0 = vadd.f32 %v2684_v36, %v6650_v1  ;;  %v2654_v48 = vadd.f32 %v2638_v51, %v6651_v14  ;;  %v2670_v62 = vsub.f32 %v4042_v56, %v6275_v19  ;;  %v2590_v38 = vpop.f32.mrb[89].mxu1  ;;  %v6663_v36 = vld [vmem:[#allocation48_spill] sm:$0xff]  ;;  %v6665_v1 = vld [vmem:[#allocation50_spill] sm:$0xff] }
 0x3f3   : > { %v2699_v8 = vadd.f32 %v2683_v61, %v6652_v37  ;;  %v2653_v63 = vadd.f32 %v2637_v46, %v6653_v15  ;;  %v2669_v16 = vsub.f32 %v2590_v38, %v6277_v41  ;;  %v3989_v13 = vpop.f32.mrb[90].mxu0  ;;  %v6655_v41 = vld [vmem:[#allocation36_spill] sm:$0xff]  ;;  %v6664_v46 = vld [vmem:[#allocation49_spill] sm:$0xff] }
 0x3f4   : > { %2732 = vst [vmem:[%s6303_s22 + $0x38] sm:$0xff] %v2700_v0  ;;  %2718 = vst [vmem:[%s6294_s9 + $0x48] sm:$0xff] %v2654_v48  ;;  %v2686_v25 = vadd.f32 %v3986_v60, %v2670_v62  ;;  %v2640_v55 = vadd.f32 %v3989_v13, %v6279_v39  ;;  %v2423_v35 = vpop.f32.mrb[91].mxu0  ;;  %v6666_v62 = vld [vmem:[#allocation51_spill] sm:$0xff] }
 0x3f5   : > { %2731 = vst [vmem:[%s6303_s22 + $0x30] sm:$0xff] %v2699_v8  ;;  %2717 = vst [vmem:[%s6294_s9 + $0x40] sm:$0xff] %v2653_v63  ;;  %v2685_v20 = vadd.f32 %v2669_v16, %v2413_v43  ;;  %v2639_v19 = vadd.f32 %v2423_v35, %v6281_v54  ;;  %v4045_v50 = vpop.f32.mrb[90].mxu1 }
 0x3f6   : > { %v2702_v59 = vadd.f32 %v2686_v25, %v6654_v45  ;;  %v2656_v17 = vadd.f32 %v2640_v55, %v6655_v41  ;;  %v2672_v11 = vsub.f32 %v4045_v50, %v6279_v39  ;;  %v2600_v28 = vpop.f32.mrb[91].mxu1 }
 0x3f7   : > { %v2701_v32 = vadd.f32 %v2685_v20, %v6656_v40  ;;  %v2655_v2 = vadd.f32 %v2639_v19, %v6657_v10  ;;  %v2671_v3 = vsub.f32 %v2600_v28, %v6281_v54  ;;  %v3992_v5 = vpop.f32.mrb[92].mxu0 }
 0x3f8   : > { %2734 = vst [vmem:[%s6303_s22 + $0x48] sm:$0xff] %v2702_v59  ;;  %2720 = vst [vmem:[%s6294_s9 + $0x58] sm:$0xff] %v2656_v17  ;;  %v2688_v26 = vadd.f32 %v3989_v13, %v2672_v11  ;;  %v2642_v42 = vadd.f32 %v3992_v5, %v6283_v23  ;;  %v2433_v9 = vpop.f32.mrb[93].mxu0 }
 0x3f9   : > { %2733 = vst [vmem:[%s6303_s22 + $0x40] sm:$0xff] %v2701_v32  ;;  %2719 = vst [vmem:[%s6294_s9 + $0x50] sm:$0xff] %v2655_v2  ;;  %v2687_v39 = vadd.f32 %v2671_v3, %v2423_v35  ;;  %v2641_v44 = vadd.f32 %v2433_v9, %v6285_v52  ;;  %v4048_v18 = vpop.f32.mrb[92].mxu1 }
 0x3fa   : > { %v2704_v54 = vadd.f32 %v2688_v26, %v6658_v22  ;;  %v2658_v4 = vadd.f32 %v2642_v42, %v6659_v21  ;;  %v2674_v30 = vsub.f32 %v4048_v18, %v6283_v23  ;;  %v2610_v12 = vpop.f32.mrb[93].mxu1 }
 0x3fb   : > { %v2703_v49 = vadd.f32 %v2687_v39, %v6660_v57  ;;  %v2657_v53 = vadd.f32 %v2641_v44, %v6661_v34  ;;  %v2673_v31 = vsub.f32 %v2610_v12, %v6285_v52  ;;  %v3995_v33 = vpop.f32.mrb[94].mxu0 }
 0x3fc   : > { %2736 = vst [vmem:[%s6303_s22 + $0x58] sm:$0xff] %v2704_v54  ;;  %2722 = vst [vmem:[%s6294_s9 + $0x68] sm:$0xff] %v2658_v4  ;;  %v2690_v6 = vadd.f32 %v3992_v5, %v2674_v30  ;;  %v2644_v7 = vadd.f32 %v3995_v33, %v6287_v29  ;;  %v2443_v24 = vpop.f32.mrb[95].mxu0 }
 0x3fd   : > { %2735 = vst [vmem:[%s6303_s22 + $0x50] sm:$0xff] %v2703_v49  ;;  %2721 = vst [vmem:[%s6294_s9 + $0x60] sm:$0xff] %v2657_v53  ;;  %v2689_v23 = vadd.f32 %v2673_v31, %v2433_v9  ;;  %v2643_v27 = vadd.f32 %v2443_v24, %v6289_v58  ;;  %v4051_v52 = vpop.f32.mrb[94].mxu1 }
 0x3fe   : > { %v2706_v60 = vadd.f32 %v2690_v6, %v6662_v47  ;;  %v2660_v51 = vadd.f32 %v2644_v7, %v6663_v36  ;;  %v2676_v43 = vsub.f32 %v4051_v52, %v6287_v29  ;;  %v2620_v61 = vpop.f32.mrb[95].mxu1 }
 0x3ff   : > { %v2705_v56 = vadd.f32 %v2689_v23, %v6664_v46  ;;  %v2659_v0 = vadd.f32 %v2643_v27, %v6665_v1  ;;  %v2675_v14 = vsub.f32 %v2620_v61, %v6289_v58 }
 0x400   : > { %2738 = vst [vmem:[%s6303_s22 + $0x68] sm:$0xff] %v2706_v60  ;;  %2724 = vst [vmem:[%s6294_s9 + $0x78] sm:$0xff] %v2660_v51  ;;  %v2692_v29 = vadd.f32 %v3995_v33, %v2676_v43 }
 0x401   : > { %2737 = vst [vmem:[%s6303_s22 + $0x60] sm:$0xff] %v2705_v56  ;;  %2723 = vst [vmem:[%s6294_s9 + $0x70] sm:$0xff] %v2659_v0  ;;  %v2691_v48 = vadd.f32 %v2675_v14, %v2443_v24 }
 0x402   : > { %v2708_v38 = vadd.f32 %v2692_v29, %v6666_v62 }
 0x403   : > { %4738 = shalt.err (!%p4735_p3)
}
 0x404   : > { %s4739_s13 = scalar_lea.hbm %s6379_s12, 2048  ;;  %s4743_s15 = scalar_lea.hbm %s6489_s6, 4096 }
 0x405   : > { %p4740_p0 = scmp.ne.s32.totalorder %s6379_s12, %s4739_s13  ;;  %p4744_p5 = scmp.lt.u32.totalorder %s6379_s12, %s6489_s6 }
 0x406   : > { %p4745_p1 = scmp.lt.u32.totalorder %s4743_s15, %s4739_s13  ;;  %p4747_p9 = scmp.lt.u32.totalorder %s4739_s13, %s6379_s12 }
 0x407   : > { %p4741_p2 = pnand %p4740_p0, %p6667_p13 }
 0x408   : > { %p4746_p7 = por %p4745_p1, %p4744_p5 }
 0x409   : > { %p4742_p10 = pneg %p4741_p2 }
 0x40a   : > { %p4748_p8 = por %p4747_p9, %p4746_p7 }
 0x40c   : > { %p4749_p6 = pnand %p4748_p8, %p4742_p10 }
 0x40e   : > { %4752 = shalt.err (!%p4749_p6)
}
 0x40f   : > { %s4862_s0 = smov 128   ;;  %s4863_s18 = smov 8   ;;  %v6668_v58 = vld [vmem:[#allocation52_spill] sm:$0xff]  ;;  %2740 = vst [vmem:[%s6303_s22 + $0x78] sm:$0xff] %v2708_v38 }
 0x410   : > { %4456 = dma.vmem_to_hbm [thread:$0]  (%p6667_p13), %s6381_s26, 2048, %s6379_s12, %s2742_s4, %s4862_s0, %s4862_s0, %s4863_s18   ;;  %v2707_v37 = vadd.f32 %v2691_v48, %v6668_v58 }
 0x411   : > { %s6669_s29 = sld [smem:[#allocation56_spill]]  ;;  %s2747_s8 = scalar_lea.sflag [#allocation14], %s5194_s17 }
 0x412   : > { %2739 = vst [vmem:[%s6303_s22 + $0x70] sm:$0xff] %v2707_v37  ;;  %s4753_s19 = scalar_lea.vmem %s6429_s21, 2048  ;;  %s4864_s27 = smov [#allocation13]  }
 0x413   : > { %p4754_p11 = scmp.ne.s32.totalorder %s6429_s21, %s4753_s19  ;;  %s4757_s26 = sshll.u32 %s4864_s27, 4  ;;  %s4758_s26 = int_to_ptr.vmem [resolvable:$false] %s4757_s26 }
 0x414   : > { %s4759_s12 = scalar_lea.vmem %s4758_s26, 4096  ;;  %p4760_p3 = scmp.lt.s32.totalorder %s6429_s21, %s4758_s26 }
 0x415   : > { %p4755_p12 = pnand %p4754_p11, %p6667_p13  ;;  %p4761_p0 = scmp.lt.s32.totalorder %s4759_s12, %s4753_s19 }
 0x417   : > { %s6670_s14 = smov %s6669_s29  ;;  %s6425_s24 = scalar_lea.hbm %s6669_s29, %s2994_s7 }
 0x418   : > { %p4756_p4 = pneg %p4755_p12  ;;  %p4762_p2 = por %p4761_p0, %p4760_p3 }
 0x41a   : > { %p4763_p10 = pnand %p4762_p2, %p4756_p4 }
 0x41c   : > { %4766 = shalt.err (!%p4763_p10)
}
 0x41d   : > { %s4767_s22 = scalar_lea.hbm %s6425_s24, 2048  ;;  %s4771_s23 = scalar_lea.hbm %s6670_s14, 4096 }
 0x41e   : > { %p4768_p5 = scmp.ne.s32.totalorder %s6425_s24, %s4767_s22  ;;  %p4772_p9 = scmp.lt.u32.totalorder %s6425_s24, %s6670_s14 }
 0x41f   : > { %p4773_p8 = scmp.lt.u32.totalorder %s4771_s23, %s4767_s22  ;;  %p4775_p11 = scmp.lt.u32.totalorder %s4767_s22, %s6425_s24 }
 0x420   : > { %p4769_p1 = pnand %p4768_p5, %p6667_p13 }
 0x421   : > { %p4774_p6 = por %p4773_p8, %p4772_p9 }
 0x422   : > { %p4770_p7 = pneg %p4769_p1 }
 0x423   : > { %p4776_p12 = por %p4775_p11, %p4774_p6 }
 0x425   : > { %p4777_p4 = pnand %p4776_p12, %p4770_p7 }
 0x427   : > { %4780 = shalt.err (!%p4777_p4)
}
 0x428   : > { %4457 = dma.vmem_to_hbm [thread:$0]  (%p6667_p13), %s6429_s21, 2048, %s6425_s24, %s2747_s8, %s4862_s0, %s4862_s0, %s4863_s18  }
 0x429 PF: > { %s6671_s10 = sld [smem:[#allocation21_spill]]  ;;  %s6672_s15 = sld [smem:[#allocation24_spill]] }
 0x42a   : > { %s6673_s11 = sld [smem:[#allocation23_spill]] }
 0x42f   : > { %s2795_s16 = sand.u32 1, %s6671_s10   ;;  %p6674_p3 = scmp.ne.s32.totalorder %s6672_s15, 0 }
 0x430   : > { %p6675_p0 = scmp.ge.s32.totalorder %s6673_s11, 2  ;;  %s2796_s30 = scalar_lea.sflag [#allocation4], %s2795_s16 }
 0x432   : > { %p4481_p2 = pnand %p6675_p0, %p6674_p3 }
 0x434   : > { %4822 = dma.done.wait (!%p4481_p2), %s2796_s30, 2048  }
 0x435   : > { %4824 = vsyncadd (!%p4481_p2), %s2796_s30, 4294965248  ;;  %s2805_s20 = scalar_lea.sflag [#allocation14], %s2795_s16 }
 0x436   : > { %4826 = dma.done.wait (!%p4481_p2), %s2805_s20, 2048  }
 0x437   : > { %4828 = vsyncadd (!%p4481_p2), %s2805_s20, 4294965248  ;;  %s27_s29 = sadd.s32 1, %s6673_s11   ;;  %s6676_s17 = sld [smem:[#allocation22_spill]] }
 0x438   : > { %p24_p10 = scmp.ge.s32.totalorder %s27_s29, 4   ;;  %s6677_s26 = sld [smem:[#allocation26_spill]] }
 0x439   : > { %s6678_s21 = sld [smem:[#allocation25_spill]]  ;;  %s6679_s24 = smov %s4835_s25 }
 0x43a   : > { %s6681_s27 = smov %s4847_s28  ;;  %26 = sbr.rel (!%p24_p10) target bundleno = 14 (0xe), region = 138 }
 0x43d   : > { %s6680_s25 = smov %s6676_s17 }
 0x43f   : > { %s6682_s28 = smov %s6678_s21 }
 0x441   :  { %2810 = vsyncpa [#allocation3], 1 }
 0x442   :  { %2812 = vsyncpa [#allocation3 + $0x1], 1 }
 0x443   :  { %2813 = vsyncpa [#allocation6], 1 }
 0x444   :  { %2814 = vsyncpa [#allocation9], 1 }
 0x445   :  { %2815 = vsyncpa [#allocation4], 1 }
 0x446   :  { %2817 = vsyncpa [#allocation4 + $0x1], 1 }
 0x447   :  { %2818 = vsyncpa [#allocation14], 1 }
 0x448   :  { %2820 = vsyncpa [#allocation14 + $0x1], 1 }

</bundles_post_ra>
